<compile_context>
chip_gen: v7x
topology: tpu7x:2x2x1
jax: 0.10.0
libtpu: 0.0.40
codegen_flags: <defaults>
</compile_context>

<pallas_src>
import jax
import jax.numpy as jnp
import numpy as np
from jax.experimental import pallas as pl
from jax.experimental.pallas import tpu as pltpu


# ------------------------------ Pallas kernel ------------------------------

def _make_kernel(H, W, KH, Cxhc, Co, TB):
    ph = KH // 2
    R = TB * H            # matmul rows per grid step
    GW = W * Co           # per-gate lane width (128 for the demo shapes)

    def kernel(xhc_ref, cold_ref, s_ref, tmain_ref, tc_ref, bias_ref,
               h_out_ref, c_out_ref):
        # (TB, H, W*Cxhc) bf16 -> (R, W*Cxhc): merges leading dims only.
        xhc = xhc_ref[...].reshape(R, W * Cxhc)
        cold = cold_ref[...].reshape(R, GW)            # f32, lane dense
        bias = bias_ref[...]                           # (1, 4*GW) f32

        def shifted_rows(kh, mat_bf16):
            # Rows shifted by (kh - ph) within each batch block with zero
            # fill at the image boundary, done as a tiny 0/1 matmul on the
            # MXU (no sublane shifts, no masked stores).  kh == ph is the
            # identity and is skipped.
            if kh == ph:
                return mat_bf16
            return jnp.dot(s_ref[kh], mat_bf16,
                           preferred_element_type=jnp.float32
                           ).astype(jnp.bfloat16)

        # ---- conv-A: fused [i | f | g | o] gates over [x, h, c_old] ----
        cc = None
        for kh in range(KH):
            part = jnp.dot(shifted_rows(kh, xhc), tmain_ref[kh],
                           preferred_element_type=jnp.float32)
            cc = part if cc is None else cc + part
        cc = cc + bias                                 # (R, 4*GW), lane dense

        i_g = jax.nn.sigmoid(cc[:, 0 * GW:1 * GW])
        f_g = jax.nn.sigmoid(cc[:, 1 * GW:2 * GW])
        g_g = jnp.tanh(cc[:, 2 * GW:3 * GW])
        c_new = f_g * cold + i_g * g_g                 # (R, GW) f32

        # ---- conv-B: c_new contribution to the o gate ----
        c_bf = c_new.astype(jnp.bfloat16)
        oc = None
        for kh in range(KH):
            part = jnp.dot(shifted_rows(kh, c_bf), tc_ref[kh],
                           preferred_element_type=jnp.float32)
            oc = part if oc is None else oc + part

        o_g = jax.nn.sigmoid(cc[:, 3 * GW:4 * GW] + oc)
        h_new = o_g * jnp.tanh(c_new)

        # Lane-dense output stores (last dim = W*Co).
        h_out_ref[...] = h_new.reshape(TB, H, GW).astype(h_out_ref.dtype)
        c_out_ref[...] = c_new.reshape(TB, H, GW).astype(c_out_ref.dtype)

    return kernel


# ------------------------------- weight prep --------------------------------

def _toeplitz_weights(w1, b1, w2, b2, w3, b3, Cin, Co, W):
    """Fuse the 3 convs and fold the W-axis SAME padding into block-Toeplitz
    weights with gate-major columns."""
    KH, KW = w1.shape[2], w1.shape[3]
    pw = KW // 2
    Cxhc = Cin + 2 * Co

    # OIHW -> HWIO.
    w1t = jnp.transpose(w1, (2, 3, 1, 0))    # (KH, KW, Cin+2Co, 2Co)
    w2t = jnp.transpose(w2, (2, 3, 1, 0))    # (KH, KW, Cin+Co,  Co)
    w3t = jnp.transpose(w3, (2, 3, 1, 0))    # (KH, KW, Cin+2Co, Co)

    zeros_c = jnp.zeros((KH, KW, Co, Co), jnp.float32)
    wf = jnp.stack([
        w1t[..., :Co],                                        # i
        w1t[..., Co:],                                        # f
        jnp.concatenate([w2t, zeros_c], axis=2),              # g (no c rows)
        jnp.concatenate([w3t[:, :, :Cin + Co, :], zeros_c],   # o (c rows via conv-B)
                        axis=2),
    ], axis=3).astype(jnp.float32)                            # (KH,KW,Cxhc,4,Co)
    wc = w3t[:, :, Cin + Co:, :].astype(jnp.float32)          # (KH,KW,Co,Co)

    # sel[xs, kw, x] = 1  iff  xs == x + kw - pw  (zero-pad along W folded in).
    xs = np.arange(W)[:, None, None]
    kw = np.arange(KW)[None, :, None]
    xo = np.arange(W)[None, None, :]
    sel = jnp.asarray((xs == xo + kw - pw).astype(np.float32))   # (W, KW, W)

    # rows = xs*Cxhc + c ; cols = g*(W*Co) + x*Co + n   (gate-major, lane dense)
    t_main = jnp.einsum('skx,hkcgn->hscgxn', sel, wf)
    t_main = t_main.reshape(KH, W * Cxhc, 4 * W * Co).astype(jnp.bfloat16)
    t_c = jnp.einsum('skx,hkcn->hscxn', sel, wc)
    t_c = t_c.reshape(KH, W * Co, W * Co).astype(jnp.bfloat16)

    b_gate = jnp.stack([b1[:Co], b1[Co:], b2, b3], axis=0)       # (4, Co)
    bias_row = jnp.broadcast_to(b_gate[:, None, :], (4, W, Co))
    bias_row = bias_row.reshape(1, 4 * W * Co).astype(jnp.float32)
    return t_main, t_c, bias_row


def _shift_matrices(KH, TB, H):
    """0/1 row-shift matrices implementing the H-axis SAME padding (block
    diagonal per batch element), used as tiny MXU matmuls in the kernel."""
    ph = KH // 2
    S = np.zeros((KH, TB * H, TB * H), np.float32)
    for kh in range(KH):
        d = kh - ph
        for b in range(TB):
            for y in range(H):
                ys = y + d
                if 0 <= ys < H:
                    S[kh, b * H + y, b * H + ys] = 1.0
    return jnp.asarray(S, dtype=jnp.bfloat16)


def _pick_tb(N, H, W, Cin, Co, KH, vmem_budget=24 * 2**20):
    """Largest divisor of N that (a) keeps >= 2 grid steps (v7x: 2 cores) and
    (b) fits the per-step VMEM footprint in a conservative budget."""
    Cxhc = Cin + 2 * Co
    fixed = (KH * (W * Cxhc) * (4 * W * Co) * 2      # t_main (bf16)
             + KH * (W * Co) * (W * Co) * 2          # t_c    (bf16)
             + 4 * W * Co * 4)                       # bias
    per_b = (H * W * Cxhc * 2                        # xhc stream (bf16)
             + 3 * H * W * Co * 4)                   # c_old + h_out + c_out (f32)
    cap = max(1, N // 2)
    best = 1
    for tb in range(1, cap + 1):
        if N % tb:
            continue
        s_bytes = KH * (tb * H) ** 2 * 2
        # x2 double-buffering on the batch-blocked streams, x2 headroom.
        if fixed + s_bytes + 4 * per_b * tb <= vmem_budget:
            best = tb
    return best


# ------------------------------- JAX wrapper --------------------------------

def conv_lstm_cell(x, h_last, c_last, params, tb=None):
    """ConvLSTMCell forward.  x: (N,Cin,H,W); h_last,c_last: (N,Co,H,W)."""
    w1, b1, w2, b2, w3, b3 = params   # PyTorch layouts: (Cout,Cin,KH,KW), (Cout,)
    N, Cin, H, W = x.shape
    Co = h_last.shape[1]
    KH, KW = w1.shape[2], w1.shape[3]
    assert KH % 2 == 1 and KW % 2 == 1, "odd kernel sizes only (SAME padding)"
    Cxhc = Cin + 2 * Co

    TB = _pick_tb(N, H, W, Cin, Co, KH) if tb is None else tb
    assert N % TB == 0

    # NCHW -> NHWC, fuse [x, h, c_old] into one bf16 MXU stream; keep a small
    # f32 c_old stream for the exact element-wise cell update.
    x_nhwc = jnp.transpose(x, (0, 2, 3, 1))
    h_nhwc = jnp.transpose(h_last, (0, 2, 3, 1))
    c_nhwc = jnp.transpose(c_last, (0, 2, 3, 1))
    xhc = jnp.concatenate([x_nhwc, h_nhwc, c_nhwc], axis=-1)
    xhc = xhc.reshape(N, H, W * Cxhc).astype(jnp.bfloat16)
    c_old = c_nhwc.reshape(N, H, W * Co).astype(jnp.float32)

    t_main, t_c, bias_row = _toeplitz_weights(w1, b1, w2, b2, w3, b3, Cin, Co, W)
    s_mats = _shift_matrices(KH, TB, H)

    kernel = _make_kernel(H, W, KH, Cxhc, Co, TB)

    def full_spec(shape):
        nd = len(shape)
        return pl.BlockSpec(shape, lambda b, _nd=nd: (0,) * _nd)

    out_shape = (jax.ShapeDtypeStruct((N, H, W * Co), jnp.float32),
                 jax.ShapeDtypeStruct((N, H, W * Co), jnp.float32))

    h_flat, c_flat = pl.pallas_call(
        kernel,
        out_shape=out_shape,
        grid_spec=pltpu.PrefetchScalarGridSpec(
            num_scalar_prefetch=0,
            grid=(N // TB,),
            in_specs=[
                pl.BlockSpec((TB, H, W * Cxhc), lambda b: (b, 0, 0)),
                pl.BlockSpec((TB, H, W * Co), lambda b: (b, 0, 0)),
                full_spec(s_mats.shape),
                full_spec(t_main.shape),
                full_spec(t_c.shape),
                full_spec(bias_row.shape),
            ],
            out_specs=[
                pl.BlockSpec((TB, H, W * Co), lambda b: (b, 0, 0)),
                pl.BlockSpec((TB, H, W * Co), lambda b: (b, 0, 0)),
            ],
        ),
        compiler_params=pltpu.CompilerParams(
            dimension_semantics=("parallel",),       # batch blocks independent
            vmem_limit_bytes=48 * 1024 * 1024),
    )(xhc, c_old, s_mats, t_main, t_c, bias_row)

    h_out = jnp.transpose(h_flat.reshape(N, H, W, Co), (0, 3, 1, 2))
    c_out = jnp.transpose(c_flat.reshape(N, H, W, Co), (0, 3, 1, 2))
    return h_out, c_out


# ---------------------------- pure-JAX reference ----------------------------

def _conv2d_nchw(x, w, b, pad):
    out = jax.lax.conv_general_dilated(
        x, w, window_strides=(1, 1),
        padding=((pad[0], pad[0]), (pad[1], pad[1])),
        dimension_numbers=('NCHW', 'OIHW', 'NCHW'))
    return out + b.reshape(1, -1, 1, 1)


def reference_forward(x, h_last, c_last, params):
    w1, b1, w2, b2, w3, b3 = params
    Co = h_last.shape[1]
    pad = (w1.shape[2] // 2, w1.shape[3] // 2)
    combined = jnp.concatenate([x, h_last, c_last], axis=1)
    cc = _conv2d_nchw(combined, w1, b1, pad)
    i = jax.nn.sigmoid(cc[:, :Co])
    f = jax.nn.sigmoid(cc[:, Co:])
    g = jnp.tanh(_conv2d_nchw(jnp.concatenate([x, h_last], axis=1), w2, b2, pad))
    c = f * c_last + i * g
    o = jax.nn.sigmoid(
        _conv2d_nchw(jnp.concatenate([x, h_last, c], axis=1), w3, b3, pad))
    h = o * jnp.tanh(c)
    return h, c


# ----------------------------------- main -----------------------------------

if __name__ == "__main__":
    N, Cin, Co, H, W = 2, 4, 8, 16, 16
    KH, KW = 3, 3

    key = jax.random.PRNGKey(0)
    keys = jax.random.split(key, 9)

    x = jax.random.normal(keys[0], (N, Cin, H, W), jnp.float32)
    h0 = jax.random.normal(keys[1], (N, Co, H, W), jnp.float32)
    c0 = jax.random.normal(keys[2], (N, Co, H, W), jnp.float32)

    def init_conv(kw_key, kb_key, cin, cout):
        bound = 1.0 / np.sqrt(cin * KH * KW)
        w = jax.random.uniform(kw_key, (cout, cin, KH, KW), jnp.float32, -bound, bound)
        b = jax.random.uniform(kb_key, (cout,), jnp.float32, -bound, bound)
        return w, b

    w1, b1 = init_conv(keys[3], keys[4], Cin + 2 * Co, 2 * Co)
    w2, b2 = init_conv(keys[5], keys[6], Cin + Co, Co)
    w3, b3 = init_conv(keys[7], keys[8], Cin + 2 * Co, Co)
    params = (w1, b1, w2, b2, w3, b3)

    h, c = conv_lstm_cell(x, h0, c0, params)
    jax.block_until_ready((h, c))

    h_ref, c_ref = reference_forward(x, h0, c0, params)
    # bf16 MXU operands (f32 accumulation) -> ~1e-2 worst-case gate error.
    np.testing.assert_allclose(np.asarray(h), np.asarray(h_ref), atol=2e-2, rtol=2e-2)
    np.testing.assert_allclose(np.asarray(c), np.asarray(c_ref), atol=2e-2, rtol=2e-2)

    print("KERNEL_OK")
</pallas_src>

<mosaic_0001>
module attributes {stable_mosaic.version = 11 : i64} {
  func.func @kernel(%arg0: i32, %arg1: memref<1x16x320xbf16, #tpu.memory_space<vmem>>, %arg2: memref<1x16x128xf32, #tpu.memory_space<vmem>>, %arg3: memref<3x16x16xbf16, #tpu.memory_space<vmem>>, %arg4: memref<3x320x512xbf16, #tpu.memory_space<vmem>>, %arg5: memref<3x128x128xbf16, #tpu.memory_space<vmem>>, %arg6: memref<1x512xf32, #tpu.memory_space<vmem>>, %arg7: memref<1x16x128xf32, #tpu.memory_space<vmem>>, %arg8: memref<1x16x128xf32, #tpu.memory_space<vmem>>) attributes {dimension_semantics = [#tpu.dimension_semantics<parallel>], iteration_bounds = array<i64: 2>, scalar_prefetch = 0 : i64, scratch_operands = 0 : i64, tpu.core_type = #tpu.core_type<tc>, window_params = [{transform_indices = @transform_0, window_bounds = array<i64: 1, 16, 320>}, {transform_indices = @transform_1, window_bounds = array<i64: 1, 16, 128>}, {pipeline_mode = #tpu.pipeline_mode<synchronous>, transform_indices = @transform_2, window_bounds = array<i64: 3, 16, 16>}, {pipeline_mode = #tpu.pipeline_mode<synchronous>, transform_indices = @transform_3, window_bounds = array<i64: 3, 320, 512>}, {pipeline_mode = #tpu.pipeline_mode<synchronous>, transform_indices = @transform_4, window_bounds = array<i64: 3, 128, 128>}, {pipeline_mode = #tpu.pipeline_mode<synchronous>, transform_indices = @transform_5, window_bounds = array<i64: 1, 512>}, {transform_indices = @transform_6, window_bounds = array<i64: 1, 16, 128>}, {transform_indices = @transform_7, window_bounds = array<i64: 1, 16, 128>}]} {
    %c0 = arith.constant 0 : index
    %c0_0 = arith.constant 0 : index
    %c0_1 = arith.constant 0 : index
    %0 = vector.load %arg1[%c0, %c0_0, %c0_1] : memref<1x16x320xbf16, #tpu.memory_space<vmem>>, vector<1x16x320xbf16>
    %1 = vector.shape_cast %0 : vector<1x16x320xbf16> to vector<16x320xbf16>
    %c0_2 = arith.constant 0 : index
    %c0_3 = arith.constant 0 : index
    %c0_4 = arith.constant 0 : index
    %2 = vector.load %arg2[%c0_2, %c0_3, %c0_4] : memref<1x16x128xf32, #tpu.memory_space<vmem>>, vector<1x16x128xf32>
    %3 = vector.shape_cast %2 : vector<1x16x128xf32> to vector<16x128xf32>
    %c0_5 = arith.constant 0 : index
    %c0_6 = arith.constant 0 : index
    %4 = vector.load %arg6[%c0_5, %c0_6] : memref<1x512xf32, #tpu.memory_space<vmem>>, vector<1x512xf32>
    %c0_7 = arith.constant 0 : index
    %c0_8 = arith.constant 0 : index
    %c0_9 = arith.constant 0 : index
    %5 = vector.load %arg3[%c0_7, %c0_8, %c0_9] : memref<3x16x16xbf16, #tpu.memory_space<vmem>>, vector<1x16x16xbf16>
    %6 = vector.shape_cast %5 : vector<1x16x16xbf16> to vector<16x16xbf16>
    %cst = arith.constant dense<0.000000e+00> : vector<16x320xf32>
    %7 = tpu.matmul %6, %1, %cst {dimension_numbers = #tpu.dot_dimension_numbers<[1], [0], [0], [1], [0, 0, 1, 1], [], []>} : vector<16x16xbf16>, vector<16x320xbf16>, vector<16x320xf32> -> vector<16x320xf32>
    %8 = arith.truncf %7 : vector<16x320xf32> to vector<16x320xbf16>
    %c0_10 = arith.constant 0 : index
    %c0_11 = arith.constant 0 : index
    %c0_12 = arith.constant 0 : index
    %9 = vector.load %arg4[%c0_10, %c0_11, %c0_12] : memref<3x320x512xbf16, #tpu.memory_space<vmem>>, vector<1x320x512xbf16>
    %10 = vector.shape_cast %9 : vector<1x320x512xbf16> to vector<320x512xbf16>
    %cst_13 = arith.constant dense<0.000000e+00> : vector<16x512xf32>
    %11 = tpu.matmul %8, %10, %cst_13 {dimension_numbers = #tpu.dot_dimension_numbers<[1], [0], [0], [1], [0, 0, 1, 1], [], []>} : vector<16x320xbf16>, vector<320x512xbf16>, vector<16x512xf32> -> vector<16x512xf32>
    %c1 = arith.constant 1 : index
    %c0_14 = arith.constant 0 : index
    %c0_15 = arith.constant 0 : index
    %12 = vector.load %arg4[%c1, %c0_14, %c0_15] : memref<3x320x512xbf16, #tpu.memory_space<vmem>>, vector<1x320x512xbf16>
    %13 = vector.shape_cast %12 : vector<1x320x512xbf16> to vector<320x512xbf16>
    %cst_16 = arith.constant dense<0.000000e+00> : vector<16x512xf32>
    %14 = tpu.matmul %1, %13, %cst_16 {dimension_numbers = #tpu.dot_dimension_numbers<[1], [0], [0], [1], [0, 0, 1, 1], [], []>} : vector<16x320xbf16>, vector<320x512xbf16>, vector<16x512xf32> -> vector<16x512xf32>
    %15 = arith.addf %11, %14 : vector<16x512xf32>
    %c2 = arith.constant 2 : index
    %c0_17 = arith.constant 0 : index
    %c0_18 = arith.constant 0 : index
    %16 = vector.load %arg3[%c2, %c0_17, %c0_18] : memref<3x16x16xbf16, #tpu.memory_space<vmem>>, vector<1x16x16xbf16>
    %17 = vector.shape_cast %16 : vector<1x16x16xbf16> to vector<16x16xbf16>
    %cst_19 = arith.constant dense<0.000000e+00> : vector<16x320xf32>
    %18 = tpu.matmul %17, %1, %cst_19 {dimension_numbers = #tpu.dot_dimension_numbers<[1], [0], [0], [1], [0, 0, 1, 1], [], []>} : vector<16x16xbf16>, vector<16x320xbf16>, vector<16x320xf32> -> vector<16x320xf32>
    %19 = arith.truncf %18 : vector<16x320xf32> to vector<16x320xbf16>
    %c2_20 = arith.constant 2 : index
    %c0_21 = arith.constant 0 : index
    %c0_22 = arith.constant 0 : index
    %20 = vector.load %arg4[%c2_20, %c0_21, %c0_22] : memref<3x320x512xbf16, #tpu.memory_space<vmem>>, vector<1x320x512xbf16>
    %21 = vector.shape_cast %20 : vector<1x320x512xbf16> to vector<320x512xbf16>
    %cst_23 = arith.constant dense<0.000000e+00> : vector<16x512xf32>
    %22 = tpu.matmul %19, %21, %cst_23 {dimension_numbers = #tpu.dot_dimension_numbers<[1], [0], [0], [1], [0, 0, 1, 1], [], []>} : vector<16x320xbf16>, vector<320x512xbf16>, vector<16x512xf32> -> vector<16x512xf32>
    %23 = arith.addf %15, %22 : vector<16x512xf32>
    %24 = vector.broadcast %4 : vector<1x512xf32> to vector<16x512xf32>
    %25 = arith.addf %23, %24 : vector<16x512xf32>
    %26 = vector.extract_strided_slice %25 {offsets = [0, 0], sizes = [16, 128], strides = [1, 1]} : vector<16x512xf32> to vector<16x128xf32>
    %27 = arith.negf %26 : vector<16x128xf32>
    %28 = math.exp %27 : vector<16x128xf32>
    %cst_24 = arith.constant 1.000000e+00 : f32
    %29 = vector.broadcast %cst_24 : f32 to vector<16x128xf32>
    %30 = arith.addf %29, %28 : vector<16x128xf32>
    %31 = arith.divf %29, %30 : vector<16x128xf32>
    %32 = vector.extract_strided_slice %25 {offsets = [0, 128], sizes = [16, 128], strides = [1, 1]} : vector<16x512xf32> to vector<16x128xf32>
    %33 = arith.negf %32 : vector<16x128xf32>
    %34 = math.exp %33 : vector<16x128xf32>
    %cst_25 = arith.constant 1.000000e+00 : f32
    %35 = vector.broadcast %cst_25 : f32 to vector<16x128xf32>
    %36 = arith.addf %35, %34 : vector<16x128xf32>
    %37 = arith.divf %35, %36 : vector<16x128xf32>
    %38 = vector.extract_strided_slice %25 {offsets = [0, 256], sizes = [16, 128], strides = [1, 1]} : vector<16x512xf32> to vector<16x128xf32>
    %39 = math.tanh %38 : vector<16x128xf32>
    %40 = arith.mulf %37, %3 : vector<16x128xf32>
    %41 = arith.mulf %31, %39 : vector<16x128xf32>
    %42 = arith.addf %40, %41 : vector<16x128xf32>
    %43 = arith.truncf %42 : vector<16x128xf32> to vector<16x128xbf16>
    %c0_26 = arith.constant 0 : index
    %c0_27 = arith.constant 0 : index
    %c0_28 = arith.constant 0 : index
    %44 = vector.load %arg3[%c0_26, %c0_27, %c0_28] : memref<3x16x16xbf16, #tpu.memory_space<vmem>>, vector<1x16x16xbf16>
    %45 = vector.shape_cast %44 : vector<1x16x16xbf16> to vector<16x16xbf16>
    %cst_29 = arith.constant dense<0.000000e+00> : vector<16x128xf32>
    %46 = tpu.matmul %45, %43, %cst_29 {dimension_numbers = #tpu.dot_dimension_numbers<[1], [0], [0], [1], [0, 0, 1, 1], [], []>} : vector<16x16xbf16>, vector<16x128xbf16>, vector<16x128xf32> -> vector<16x128xf32>
    %47 = arith.truncf %46 : vector<16x128xf32> to vector<16x128xbf16>
    %c0_30 = arith.constant 0 : index
    %c0_31 = arith.constant 0 : index
    %c0_32 = arith.constant 0 : index
    %48 = vector.load %arg5[%c0_30, %c0_31, %c0_32] : memref<3x128x128xbf16, #tpu.memory_space<vmem>>, vector<1x128x128xbf16>
    %49 = vector.shape_cast %48 : vector<1x128x128xbf16> to vector<128x128xbf16>
    %cst_33 = arith.constant dense<0.000000e+00> : vector<16x128xf32>
    %50 = tpu.matmul %47, %49, %cst_33 {dimension_numbers = #tpu.dot_dimension_numbers<[1], [0], [0], [1], [0, 0, 1, 1], [], []>} : vector<16x128xbf16>, vector<128x128xbf16>, vector<16x128xf32> -> vector<16x128xf32>
    %c1_34 = arith.constant 1 : index
    %c0_35 = arith.constant 0 : index
    %c0_36 = arith.constant 0 : index
    %51 = vector.load %arg5[%c1_34, %c0_35, %c0_36] : memref<3x128x128xbf16, #tpu.memory_space<vmem>>, vector<1x128x128xbf16>
    %52 = vector.shape_cast %51 : vector<1x128x128xbf16> to vector<128x128xbf16>
    %cst_37 = arith.constant dense<0.000000e+00> : vector<16x128xf32>
    %53 = tpu.matmul %43, %52, %cst_37 {dimension_numbers = #tpu.dot_dimension_numbers<[1], [0], [0], [1], [0, 0, 1, 1], [], []>} : vector<16x128xbf16>, vector<128x128xbf16>, vector<16x128xf32> -> vector<16x128xf32>
    %54 = arith.addf %50, %53 : vector<16x128xf32>
    %c2_38 = arith.constant 2 : index
    %c0_39 = arith.constant 0 : index
    %c0_40 = arith.constant 0 : index
    %55 = vector.load %arg3[%c2_38, %c0_39, %c0_40] : memref<3x16x16xbf16, #tpu.memory_space<vmem>>, vector<1x16x16xbf16>
    %56 = vector.shape_cast %55 : vector<1x16x16xbf16> to vector<16x16xbf16>
    %cst_41 = arith.constant dense<0.000000e+00> : vector<16x128xf32>
    %57 = tpu.matmul %56, %43, %cst_41 {dimension_numbers = #tpu.dot_dimension_numbers<[1], [0], [0], [1], [0, 0, 1, 1], [], []>} : vector<16x16xbf16>, vector<16x128xbf16>, vector<16x128xf32> -> vector<16x128xf32>
    %58 = arith.truncf %57 : vector<16x128xf32> to vector<16x128xbf16>
    %c2_42 = arith.constant 2 : index
    %c0_43 = arith.constant 0 : index
    %c0_44 = arith.constant 0 : index
    %59 = vector.load %arg5[%c2_42, %c0_43, %c0_44] : memref<3x128x128xbf16, #tpu.memory_space<vmem>>, vector<1x128x128xbf16>
    %60 = vector.shape_cast %59 : vector<1x128x128xbf16> to vector<128x128xbf16>
    %cst_45 = arith.constant dense<0.000000e+00> : vector<16x128xf32>
    %61 = tpu.matmul %58, %60, %cst_45 {dimension_numbers = #tpu.dot_dimension_numbers<[1], [0], [0], [1], [0, 0, 1, 1], [], []>} : vector<16x128xbf16>, vector<128x128xbf16>, vector<16x128xf32> -> vector<16x128xf32>
    %62 = arith.addf %54, %61 : vector<16x128xf32>
    %63 = vector.extract_strided_slice %25 {offsets = [0, 384], sizes = [16, 128], strides = [1, 1]} : vector<16x512xf32> to vector<16x128xf32>
    %64 = arith.addf %63, %62 : vector<16x128xf32>
    %65 = arith.negf %64 : vector<16x128xf32>
    %66 = math.exp %65 : vector<16x128xf32>
    %cst_46 = arith.constant 1.000000e+00 : f32
    %67 = vector.broadcast %cst_46 : f32 to vector<16x128xf32>
    %68 = arith.addf %67, %66 : vector<16x128xf32>
    %69 = arith.divf %67, %68 : vector<16x128xf32>
    %70 = math.tanh %42 : vector<16x128xf32>
    %71 = arith.mulf %69, %70 : vector<16x128xf32>
    %72 = vector.shape_cast %71 : vector<16x128xf32> to vector<1x16x128xf32>
    %c0_47 = arith.constant 0 : index
    %c0_48 = arith.constant 0 : index
    %c0_49 = arith.constant 0 : index
    %73 = vector.load %arg7[%c0_47, %c0_48, %c0_49] : memref<1x16x128xf32, #tpu.memory_space<vmem>>, vector<1x16x128xf32>
    tpu.vector_store %arg7[%c0_47, %c0_48, %c0_49], %72 {strides = array<i32>} : memref<1x16x128xf32, #tpu.memory_space<vmem>>, vector<1x16x128xf32>,
    %74 = vector.shape_cast %42 : vector<16x128xf32> to vector<1x16x128xf32>
    %c0_50 = arith.constant 0 : index
    %c0_51 = arith.constant 0 : index
    %c0_52 = arith.constant 0 : index
    %75 = vector.load %arg8[%c0_50, %c0_51, %c0_52] : memref<1x16x128xf32, #tpu.memory_space<vmem>>, vector<1x16x128xf32>
    tpu.vector_store %arg8[%c0_50, %c0_51, %c0_52], %74 {strides = array<i32>} : memref<1x16x128xf32, #tpu.memory_space<vmem>>, vector<1x16x128xf32>,
    return
  }
  func.func @transform_0(%arg0: i32) -> (i32, i32, i32) {
    %c0_i32 = arith.constant 0 : i32
    %c0_i32_0 = arith.constant 0 : i32
    %c0_i32_1 = arith.constant 0 : i32
    return %arg0, %c0_i32, %c0_i32_0 : i32, i32, i32
  }
  func.func @transform_1(%arg0: i32) -> (i32, i32, i32) {
    %c0_i32 = arith.constant 0 : i32
    %c0_i32_0 = arith.constant 0 : i32
    %c0_i32_1 = arith.constant 0 : i32
    return %arg0, %c0_i32, %c0_i32_0 : i32, i32, i32
  }
  func.func @transform_2(%arg0: i32) -> (i32, i32, i32) {
    %c0_i32 = arith.constant 0 : i32
    %c0_i32_0 = arith.constant 0 : i32
    %c0_i32_1 = arith.constant 0 : i32
    %c0_i32_2 = arith.constant 0 : i32
    return %c0_i32, %c0_i32_0, %c0_i32_1 : i32, i32, i32
  }
  func.func @transform_3(%arg0: i32) -> (i32, i32, i32) {
    %c0_i32 = arith.constant 0 : i32
    %c0_i32_0 = arith.constant 0 : i32
    %c0_i32_1 = arith.constant 0 : i32
    %c0_i32_2 = arith.constant 0 : i32
    return %c0_i32, %c0_i32_0, %c0_i32_1 : i32, i32, i32
  }
  func.func @transform_4(%arg0: i32) -> (i32, i32, i32) {
    %c0_i32 = arith.constant 0 : i32
    %c0_i32_0 = arith.constant 0 : i32
    %c0_i32_1 = arith.constant 0 : i32
    %c0_i32_2 = arith.constant 0 : i32
    return %c0_i32, %c0_i32_0, %c0_i32_1 : i32, i32, i32
  }
  func.func @transform_5(%arg0: i32) -> (i32, i32) {
    %c0_i32 = arith.constant 0 : i32
    %c0_i32_0 = arith.constant 0 : i32
    %c0_i32_1 = arith.constant 0 : i32
    return %c0_i32, %c0_i32_0 : i32, i32
  }
  func.func @transform_6(%arg0: i32) -> (i32, i32, i32) {
    %c0_i32 = arith.constant 0 : i32
    %c0_i32_0 = arith.constant 0 : i32
    %c0_i32_1 = arith.constant 0 : i32
    return %arg0, %c0_i32, %c0_i32_0 : i32, i32, i32
  }
  func.func @transform_7(%arg0: i32) -> (i32, i32, i32) {
    %c0_i32 = arith.constant 0 : i32
    %c0_i32_0 = arith.constant 0 : i32
    %c0_i32_1 = arith.constant 0 : i32
    return %arg0, %c0_i32, %c0_i32_0 : i32, i32, i32
  }
}

</mosaic_0001>

<bundles_post_ra>
// kernel: tpu_custom_call.1
= control target key start
LH: loop header
LB: loop body
LE: loop exit
PB: predicated region body
PF: predicated region fallthrough
CT: control target
= control target key end

     0   :  { %s5056_s0 = inlined_call_operand.hbm [shape: bf16[2,16,320], index: 0, kind: input, shape index: {}]   ;;  %s5057_s1 = inlined_call_operand.hbm [shape: f32[2,16,128], index: 1, kind: input, shape index: {}]   ;;  %s5058_s2 = inlined_call_operand.hbm [shape: bf16[3,16,16], index: 2, kind: input, shape index: {}]   ;;  %s5059_s3 = inlined_call_operand.hbm [shape: bf16[3,320,512], index: 3, kind: input, shape index: {}]   ;;  %s5060_s4 = inlined_call_operand.hbm [shape: bf16[3,128,128], index: 4, kind: input, shape index: {}]   ;;  %s5061_s5 = inlined_call_operand.vmem [shape: f32[1,512], index: 5, kind: input, shape index: {}]   ;;  %s5062_s6 = inlined_call_operand.hbm [shape: f32[2,16,128], index: 6, kind: output, shape index: {0}]   ;;  %s5063_s7 = inlined_call_operand.hbm [shape: f32[2,16,128], index: 7, kind: output, shape index: {1}]  }
   0x1   :  { %5070 = sst [smem:[#allocation21_spill]] %s5056_s0 }
   0x2   :  { %5071 = sst [smem:[#allocation22_spill]] %s5058_s2 }
   0x3   :  { %5072 = sst [smem:[#allocation23_spill]] %s5059_s3 }
   0x4   :  { %5073 = sst [smem:[#allocation24_spill]] %s5060_s4 }
   0x5   :  { %13 = vsyncpa [#allocation3], 0 }
   0x6   :  { %15 = vsyncpa [#allocation3 + $0x1], 0 }
   0x7   :  { %16 = vsyncpa [#allocation6], 0 }
   0x8   :  { %18 = vsyncpa [#allocation6 + $0x1], 0 }
   0x9   :  { %19 = vsyncpa [#allocation9], 0 }
   0xa   :  { %20 = vsyncpa [#allocation4], 0 }
   0xb   :  { %22 = vsyncpa [#allocation4 + $0x1], 0 }
   0xc   :  { %23 = vsyncpa [#allocation13], 0 }
   0xd   :  { %25 = vsyncpa [#allocation13 + $0x1], 0  ;;  %s4590_s24 = smov 0   ;;  %s4592_s25 = smov 0  }
   0xe   :  { %s4594_s26 = smov 0   ;;  %s4596_s27 = smov 0  }
   0xf LB: > { %s4611_s28 = sadd.s32 4294967295, %s4528_s27   ;;  %s3265_s29 = sadd.s32 4294967294, %s4528_s27   ;;  %s4528_s27 = sphi %s4596_s27, %s5101_s27   ;;  %s4524_s26 = sphi %s4594_s26, %s5100_s26   ;;  %s4520_s25 = sphi %s4592_s25, %s5099_s25   ;;  %s4516_s24 = sphi %s4590_s24, %s5098_s24  }
  0x10   : > { %p51_p0 = scmp.ne.s32.totalorder %s4520_s25, %s4516_s24  ;;  %p5064_p1 = scmp.eq.s32.totalorder %s4611_s28, 0 }
  0x11   : > { %p191_p3 = scmp.eq.s32.totalorder %s3265_s29, 1  ;;  %p3266_p5 = scmp.ge.s32.totalorder %s4528_s27, 1 }
  0x12   : > { %p4620_p4 = por %p5064_p1, %p51_p0  ;;  %p224_p7 = scmp.lt.s32.totalorder %s4528_s27, 3 }
  0x13   : > { %p4625_p6 = por %p191_p3, %p51_p0  ;;  %s4530_s10 = smov [#allocation7]  }
  0x14   : > { %s5074_s30 = scalar_select %p4620_p4, 1, 0 }
  0x15   : > { %s5075_s8 = scalar_select %p4625_p6, 1, 0 }
  0x16   : > { %p4630_p8 = pnand %p3266_p5, %p224_p7  ;;  %s236_s11 = sshll.u32 %s4530_s10, 4  ;;  %s4634_s11 = int_to_ptr.vmem [resolvable:$true] %s236_s11 }
  0x17   : > { %5076 = sst [smem:[#allocation20_spill]] %s5075_s8  ;;  %s4531_s13 = smov [#allocation8]  }
  0x18   : > { %s5077_s9 = scalar_select %p4630_p8, 1, 0 }
  0x19   : > { %p3768_p9 = pneg %p4630_p8  ;;  %s249_s14 = sshll.u32 %s4531_s13, 4  ;;  %s4645_s14 = int_to_ptr.vmem [resolvable:$true] %s249_s14 }
  0x1a   : > { %s5079_s2 = sld [smem:[#allocation22_spill]] }
  0x1b   : > { %p4641_p11 = pnand %p3768_p9, %p5064_p1 }
  0x1d   : > { %p4655_p13 = pneg %p4641_p11 }
  0x20   : > { %s4274_s17 = scalar_lea.hbm %s5079_s2, 384 }
  0x21   : > { %p4275_p12 = scmp.ne.s32.totalorder %s5079_s2, %s4274_s17  ;;  %p4281_p5 = scmp.lt.u32.totalorder %s4274_s17, %s5079_s2 }
  0x23   : > { %p4277_p0 = pnand %p4655_p13, %p4275_p12 }
  0x25   : > { %p4278_p3 = pneg %p4277_p0 }
  0x27   : > { %p4283_p7 = pnand %p4281_p5, %p4278_p3 }
  0x29   : > { %4286 = shalt.err (!%p4283_p7)
}
  0x2a   : > { %s4287_s23 = scalar_lea.vmem %s4634_s11, 384  ;;  %p4295_p2 = scmp.lt.s32.totalorder %s4634_s11, %s4634_s11 }
  0x2b   : > { %p4288_p9 = scmp.ne.s32.totalorder %s4634_s11, %s4287_s23  ;;  %p4296_p6 = scmp.lt.s32.totalorder %s4287_s23, %s4287_s23 }
  0x2d   : > { %p4290_p10 = pnand %p4288_p9, %p4655_p13  ;;  %p4297_p12 = por %p4296_p6, %p4295_p2 }
  0x2f   : > { %p4291_p1 = pneg %p4290_p10 }
  0x31   : > { %p4298_p0 = pnand %p4297_p12, %p4291_p1 }
  0x33   : > { %4301 = shalt.err (!%p4298_p0)
}
  0x34   : > { %s5065_s29 = smov 64   ;;  %s5066_s10 = smov 4  }
  0x35   : > { %3771 = dma.hbm_to_vmem [thread:$0]  (!%p4641_p11), %s5079_s2, 384, %s4634_s11, [#allocation6], %s5065_s29, %s5065_s29, %s5066_s10  }
  0x36   : > { %s5081_s3 = sld [smem:[#allocation23_spill]] }
  0x3c   : > { %s4302_s18 = scalar_lea.hbm %s5081_s3, 30720 }
  0x3d   : > { %p4303_p1 = scmp.ne.s32.totalorder %s5081_s3, %s4302_s18  ;;  %p4309_p10 = scmp.lt.u32.totalorder %s4302_s18, %s5081_s3 }
  0x3f   : > { %p4305_p2 = pnand %p4303_p1, %p4655_p13 }
  0x41   : > { %p4306_p6 = pneg %p4305_p2 }
  0x43   : > { %p4311_p3 = pnand %p4309_p10, %p4306_p6 }
  0x45   : > { %4314 = shalt.err (!%p4311_p3)
}
  0x46   : > { %s4315_s11 = scalar_lea.vmem %s4645_s14, 30720  ;;  %p4323_p12 = scmp.lt.s32.totalorder %s4645_s14, %s4645_s14 }
  0x47   : > { %p4316_p5 = scmp.ne.s32.totalorder %s4645_s14, %s4315_s11  ;;  %p4324_p0 = scmp.lt.s32.totalorder %s4315_s11, %s4315_s11 }
  0x49   : > { %p4318_p7 = pnand %p4316_p5, %p4655_p13  ;;  %p4325_p1 = por %p4324_p0, %p4323_p12 }
  0x4b   : > { %p4319_p9 = pneg %p4318_p7 }
  0x4d   : > { %p4326_p2 = pnand %p4325_p1, %p4319_p9 }
  0x4f   : > { %4329 = shalt.err (!%p4326_p2)
}
  0x50   : > { %s4534_s13 = smov 256   ;;  %s4535_s15 = smov 16  }
  0x51   : > { %3774 = dma.hbm_to_vmem [thread:$0]  (!%p4641_p11), %s5081_s3, 30720, %s4645_s14, [#allocation9], %s4534_s13, %s4534_s13, %s4535_s15  }
  0x52   : > { %s4536_s18 = smov [#allocation10]   ;;  %s4703_s21 = sadd.s32 1, %s4528_s27  }
  0x53   : > { %s262_s19 = sshll.u32 %s4536_s18, 4  ;;  %s5082_s4 = sld [smem:[#allocation24_spill]]  ;;  %s263_s19 = int_to_ptr.vmem [resolvable:$true] %s262_s19 }
  0x59   : > { %s4330_s11 = scalar_lea.hbm %s5082_s4, 3072 }
  0x5a   : > { %p4331_p6 = scmp.ne.s32.totalorder %s5082_s4, %s4330_s11  ;;  %p4337_p5 = scmp.lt.u32.totalorder %s4330_s11, %s5082_s4 }
  0x5c   : > { %p4333_p10 = pnand %p4331_p6, %p4655_p13 }
  0x5e   : > { %p4334_p3 = pneg %p4333_p10 }
  0x60   : > { %p4339_p7 = pnand %p4337_p5, %p4334_p3 }
  0x62   : > { %4342 = shalt.err (!%p4339_p7)
}
  0x63   : > { %s4343_s14 = scalar_lea.vmem %s263_s19, 3072  ;;  %p4351_p1 = scmp.lt.s32.totalorder %s263_s19, %s263_s19 }
  0x64   : > { %p4344_p9 = scmp.ne.s32.totalorder %s263_s19, %s4343_s14  ;;  %p4352_p2 = scmp.lt.s32.totalorder %s4343_s14, %s4343_s14 }
  0x66   : > { %p4346_p12 = pnand %p4344_p9, %p4655_p13  ;;  %p4353_p4 = por %p4352_p2, %p4351_p1 }
  0x68   : > { %p4347_p0 = pneg %p4346_p12 }
  0x6a   : > { %p4354_p8 = pnand %p4353_p4, %p4347_p0 }
  0x6c   : > { %4357 = shalt.err (!%p4354_p8)
}
  0x6d   : > { %s5083_s29 = smov 4   ;;  %s5084_s10 = smov 64  }
  0x6e   : > { %3777 = dma.hbm_to_vmem [thread:$0]  (!%p4641_p11), %s5082_s4, 3072, %s263_s19, [#allocation9], %s5084_s10, %s5084_s10, %s5083_s29  }
  0x6f   : > { %s35_s20 = ssub.s32 %s4528_s27, %s4703_s21  ;;  %s38_s12 = sadd.s32 1, %s4524_s26 }
  0x70   : > { %p36_p4 = scmp.eq.s32.totalorder %s35_s20, 0  ;;  %p45_p8 = scmp.ne.s32.totalorder %s4524_s26, %s4520_s25 }
  0x71   : > { %p46_p13 = scmp.eq.s32.totalorder %s4528_s27, 0  ;;  %p3795_p6 = scmp.lt.s32.totalorder %s4528_s27, 2 }
  0x72   : > { %s4734_s13 = scalar_select %p36_p4, %s4524_s26, %s38_s12  }
  0x73   : > { %p47_p10 = por %p46_p13, %p45_p8  ;;  %p5085_p3 = scmp.eq.s32.totalorder %s4611_s28, 1 }
  0x74   : > { %s4743_s16 = sand.u32 1, %s4524_s26   ;;  %s3746_s17 = smul.u32 384, %s4528_s27 }
  0x75   : > { %p4738_p5 = por %p5085_p3, %p45_p8  ;;  %s3745_s18 = smul.u32 24, %s4743_s16 }
  0x76   : > { %s5087_s0 = sld [smem:[#allocation21_spill]]  ;;  %p4752_p11 = pnand %p3795_p6, %p47_p10 }
  0x77   : > { %s283_s14 = scalar_lea.vmem [#allocation2], %s3745_s18  ;;  %s280_s10 = scalar_lea.sflag [#allocation3], %s4743_s16 }
  0x78   : > { %s290_s29 = sshll.u32 %s283_s14, 4  ;;  %p4360_p9 = pneg %p4752_p11  ;;  %s4756_s29 = int_to_ptr.vmem [resolvable:$true] %s290_s29 }
  0x7c   : > { %s4750_s23 = scalar_lea.hbm %s5087_s0, %s3746_s17  ;;  %s4363_s12 = scalar_lea.hbm %s5087_s0, 768 }
  0x7d   : > { %s4358_s2 = scalar_lea.hbm %s4750_s23, 384  ;;  %p4364_p1 = scmp.lt.u32.totalorder %s4750_s23, %s5087_s0 }
  0x7e   : > { %p4359_p7 = scmp.ne.s32.totalorder %s4750_s23, %s4358_s2  ;;  %p4365_p2 = scmp.lt.u32.totalorder %s4363_s12, %s4358_s2 }
  0x7f   : > { %p4367_p8 = scmp.lt.u32.totalorder %s4358_s2, %s4750_s23 }
  0x80   : > { %p4361_p12 = pnand %p4360_p9, %p4359_p7  ;;  %p4366_p4 = por %p4365_p2, %p4364_p1 }
  0x82   : > { %p4362_p0 = pneg %p4361_p12  ;;  %p4368_p13 = por %p4367_p8, %p4366_p4 }
  0x84   : > { %p4369_p6 = pnand %p4368_p13, %p4362_p0 }
  0x86   : > { %4372 = shalt.err (!%p4369_p6)
}
  0x87   : > { %s4373_s18 = scalar_lea.vmem %s4756_s29, 384  ;;  %s4537_s22 = smov [#allocation2]  }
  0x88   : > { %p4374_p10 = scmp.ne.s32.totalorder %s4756_s29, %s4373_s18  ;;  %s4378_s14 = sshll.u32 %s4537_s22, 4  ;;  %s4379_s14 = int_to_ptr.vmem [resolvable:$false] %s4378_s14 }
  0x89   : > { %s4380_s8 = scalar_lea.vmem %s4379_s14, 768  ;;  %p4381_p12 = scmp.lt.s32.totalorder %s4756_s29, %s4379_s14 }
  0x8a   : > { %p4376_p3 = pnand %p4374_p10, %p4360_p9  ;;  %p4382_p1 = scmp.lt.s32.totalorder %s4380_s8, %s4373_s18 }
  0x8c   : > { %p4377_p7 = pneg %p4376_p3  ;;  %p4383_p2 = por %p4382_p1, %p4381_p12 }
  0x8e   : > { %p4384_p4 = pnand %p4383_p2, %p4377_p7 }
  0x90   : > { %4387 = shalt.err (!%p4384_p4)
}
  0x91   : > { %s4538_s2 = smov 192   ;;  %s4539_s20 = smov 12  }
  0x92   : > { %3781 = dma.hbm_to_vmem [thread:$0]  (!%p4752_p11), %s4750_s23, 384, %s4756_s29, %s280_s10, %s4538_s2, %s4538_s2, %s4539_s20  }
  0x93   : > { %s300_s12 = sand.u32 1, %s4528_s27   ;;  %s3272_s17 = sshll.u32 %s4743_s16, 4 }
  0x94   : > { %s3577_s19 = sshll.u32 %s4528_s27, 8  ;;  %s304_s18 = scalar_lea.vmem [#allocation5], %s3272_s17 }
  0x95   : > { %s311_s22 = sshll.u32 %s304_s18, 4  ;;  %s4792_s0 = scalar_lea.hbm %s5057_s1, %s3577_s19  ;;  %s4794_s22 = int_to_ptr.vmem [resolvable:$true] %s311_s22 }
  0x96   : > { %s4796_s3 = scalar_lea.sflag [#allocation6], %s300_s12  ;;  %s4388_s4 = scalar_lea.hbm %s4792_s0, 256 }
  0x97   : > { %p4389_p0 = scmp.ne.s32.totalorder %s4792_s0, %s4388_s4  ;;  %s4393_s29 = scalar_lea.hbm %s5057_s1, 512 }
  0x98   : > { %p4394_p6 = scmp.lt.u32.totalorder %s4792_s0, %s5057_s1  ;;  %p4395_p10 = scmp.lt.u32.totalorder %s4393_s29, %s4388_s4 }
  0x99   : > { %p4391_p8 = pnand %p4389_p0, %p4360_p9  ;;  %p4397_p7 = scmp.lt.u32.totalorder %s4388_s4, %s4792_s0 }
  0x9a   : > { %p4396_p3 = por %p4395_p10, %p4394_p6 }
  0x9b   : > { %p4392_p13 = pneg %p4391_p8 }
  0x9c   : > { %p4398_p12 = por %p4397_p7, %p4396_p3 }
  0x9e   : > { %p4399_p1 = pnand %p4398_p12, %p4392_p13 }
  0xa0   : > { %4402 = shalt.err (!%p4399_p1)
}
  0xa1   : > { %s4403_s20 = scalar_lea.vmem %s4794_s22, 256  ;;  %s4540_s12 = smov [#allocation5]  }
  0xa2   : > { %p4404_p2 = scmp.ne.s32.totalorder %s4794_s22, %s4403_s20  ;;  %s4408_s17 = sshll.u32 %s4540_s12, 4  ;;  %s4409_s17 = int_to_ptr.vmem [resolvable:$false] %s4408_s17 }
  0xa3   : > { %s4410_s19 = scalar_lea.vmem %s4409_s17, 512  ;;  %p4411_p8 = scmp.lt.s32.totalorder %s4794_s22, %s4409_s17 }
  0xa4   : > { %p4406_p4 = pnand %p4404_p2, %p4360_p9  ;;  %p4412_p6 = scmp.lt.s32.totalorder %s4410_s19, %s4403_s20 }
  0xa6   : > { %p4407_p0 = pneg %p4406_p4  ;;  %p4413_p10 = por %p4412_p6, %p4411_p8 }
  0xa8   : > { %p4414_p3 = pnand %p4413_p10, %p4407_p0 }
  0xaa   : > { %4417 = shalt.err (!%p4414_p3)
}
  0xab   : > { %s4541_s4 = smov 128   ;;  %s4542_s18 = smov 8  }
  0xac   : > { %3784 = dma.hbm_to_vmem [thread:$0]  (!%p4752_p11), %s4792_s0, 256, %s4794_s22, %s4796_s3, %s4541_s4, %s4541_s4, %s4542_s18  }
  0xad   : > { %p5089_p9 = scmp.ne.s32.totalorder %s5077_s9, 0 }
  0xae   : > { %s4825_s14 = sand.u32 (!%p5089_p9), 1, %s4520_s25   ;;  %p5090_p13 = scmp.ne.s32.totalorder (!%p5089_p9), %s5074_s30, 0 }
  0xaf   : > { %323 = sbr.rel (%p5089_p9) target bundleno = 1443 (0x5a3), region = 44  ;;  %s326_s16 = scalar_lea.sflag (!%p5089_p9), [#allocation3], %s4825_s14 }
  0xb0   : > { %s3747_s8 = smul.u32 (!%p5089_p9), 24, %s4825_s14 }
  0xb2   : > { %s4829_s23 = scalar_lea.vmem (!%p5089_p9), [#allocation2], %s3747_s8 }
  0xb6   : > { %4491 = dma.done.wait (%p5090_p13), %s326_s16, 384  }
  0xb7   : > { %4493 = vsyncadd (%p5090_p13), %s326_s16, 4294966912  ;;  %s334_s0 = sand.u32 1, %s4611_s28   ;;  %s4837_s3 = sshll.u32 %s4825_s14, 4 }
  0xb8   : > { %s335_s9 = scalar_lea.sflag [#allocation6], %s334_s0  ;;  %s338_s11 = scalar_lea.vmem [#allocation5], %s4837_s3 }
  0xb9   : > { %4495 = dma.done.wait (%p5090_p13), %s335_s9, 256  }
  0xba   : > { %4497 = vsyncadd (%p5090_p13), %s335_s9, 4294967040  ;;  %p5091_p11 = scmp.eq.s32.totalorder %s4611_s28, 0 }
  0xbc   : > { %4499 = dma.done.wait (%p5091_p11), [#allocation6], 384   ;;  %p5092_p7 = pmov %p5091_p11 }
  0xbe   : > { %4501 = vsyncadd (%p5092_p7), [#allocation6], 4294966912  ;;  %p5093_p12 = pmov %p5092_p7 }
  0xbf   : > { %p5094_p1 = pmov %p5092_p7 }
  0xc0   : > { %4503 = dma.done.wait (%p5093_p12), [#allocation9], 33792  }
  0xc1   : > { %4505 = vsyncadd (%p5094_p1), [#allocation9], 4294933504  ;;  %v4543_v0 = vmov 0   ;;  %v4544_v1 = vmov 0.0   ;;  %vm4545_vm0 = vmmov 0   ;;  %v3851_v4 = vld [vmem:[#allocation7] sm:$0xff]  }
  0xc2   : > { %458 = vmatprep.mubr.bf16.mxu0 %v4543_v0  ;;  %3615 = vmatprep.subr.bf16.mxu1 %v4544_v1  ;;  %v3848_v2 = vld [vmem:[%s4829_s23 + $0x4] ss:$12 sps:$4 sm:$0xff]   ;;  %v4858_v3 = vld [vmem:[%s4829_s23] ss:$12 sps:$4 sm:$0xff]   ;;  %vm422_vm1 = vcmask 130048   ;;  %vm1074_vm2 = vcmask 523264  }
  0xc3   : > { %3617 = vmatprep.mubr.msk.bf16.mxu1 %vm4545_vm0, %v4544_v1  ;;  %426 = vmatprep.subr.bf16.mxu0 %v3848_v2  ;;  %v4862_v5 = vld [vmem:[%s4829_s23 + $0x8] ss:$12 sps:$4 sm:$0xff]   ;;  %s4923_s29 = scalar_lea.vmem [#allocation12], %s4837_s3  ;;  %s3578_s10 = sshll.u32 %s4611_s28, 8 }
  0xc4   : > { %427 = vmatpush1.bf16.msra.mxu0 %v4858_v3  ;;  %v3853_v6 = vld [vmem:[#allocation8 + $0x280] ss:$16 sps:$4 sm:$0xff]   ;;  %v3855_v7 = vld [vmem:[#allocation8 + $0x284] ss:$16 sps:$4 sm:$0xff]   ;;  %3616 = vmatpush3.bf16.msra.mxu1 %v4862_v5  ;;  %v3856_v8 = vld [vmem:[#allocation8 + $0x288] ss:$16 sps:$4 sm:$0xff]   ;;  %s4965_s12 = scalar_lea.hbm %s5063_s7, %s3578_s10 }
  0xc5   : > { %v3858_v9 = vld [vmem:[#allocation8 + $0x28c] ss:$16 sps:$4 sm:$0xff]   ;;  %1078 = vmatprep.subr.bf16.mxu0 %v3855_v7  ;;  %v3859_v10 = vld [vmem:[#allocation8 + $0x2a0] ss:$16 sps:$4 sm:$0xff]   ;;  %v3861_v11 = vld [vmem:[#allocation8 + $0x2a4] ss:$16 sps:$4 sm:$0xff]  }
  0xc6   : > { %1164 = vmatprep.subr.bf16.mxu1 %v3858_v9  ;;  %v3864_v12 = vld [vmem:[#allocation8 + $0x2ac] ss:$16 sps:$4 sm:$0xff]   ;;  %v3862_v13 = vld [vmem:[#allocation8 + $0x2a8] ss:$16 sps:$4 sm:$0xff]   ;;  %v3867_v14 = vld [vmem:[#allocation8 + $0x2c4] ss:$16 sps:$4 sm:$0xff]  }
  0xc7   : > { %3286 = vmatmul.mubr.msk.bf16.vlgmr.msra.gmra.mrb[0].mxu0 %vm422_vm1, %v3851_v4  ;;  %3618 = vmatmul.mubr.msk.bf16.vlgmr.msra.gmra.mrb[0].mxu1 %vm422_vm1, %v3851_v4  ;;  %v3865_v15 = vld [vmem:[#allocation8 + $0x2c0] ss:$16 sps:$4 sm:$0xff]   ;;  %v3870_v16 = vld [vmem:[#allocation8 + $0x2cc] ss:$16 sps:$4 sm:$0xff]   ;;  %v3873_v17 = vld [vmem:[#allocation8 + $0x2e4] ss:$16 sps:$4 sm:$0xff]  }
  0xc8   : > { %1079 = vmatpush1.bf16.msra.mxu0 %v3853_v6  ;;  %1110 = vmatprep.mubr.bf16.mxu0 %v3848_v2  ;;  %v3868_v18 = vld [vmem:[#allocation8 + $0x2c8] ss:$16 sps:$4 sm:$0xff]   ;;  %v3876_v19 = vld [vmem:[#allocation8 + $0x2ec] ss:$16 sps:$4 sm:$0xff]   ;;  %v3871_v20 = vld [vmem:[#allocation8 + $0x2e0] ss:$16 sps:$4 sm:$0xff]  }
  0xc9   : > { %1165 = vmatpush1.bf16.msra.mxu1 %v3856_v8  ;;  %1080 = vmatprep.subr.bf16.mxu0 %v3861_v11  ;;  %v3879_v21 = vld [vmem:[#allocation8 + $0x304] ss:$16 sps:$4 sm:$0xff]   ;;  %v3874_v22 = vld [vmem:[#allocation8 + $0x2e8] ss:$16 sps:$4 sm:$0xff]   ;;  %v3882_v23 = vld [vmem:[#allocation8 + $0x30c] ss:$16 sps:$4 sm:$0xff]  }
  0xca   : > { %1166 = vmatprep.subr.bf16.mxu1 %v3864_v12  ;;  %1196 = vmatprep.mubr.bf16.mxu1 %v3848_v2  ;;  %v3877_v24 = vld [vmem:[#allocation8 + $0x300] ss:$16 sps:$4 sm:$0xff]   ;;  %v3885_v25 = vld [vmem:[#allocation8 + $0x324] ss:$16 sps:$4 sm:$0xff]   ;;  %v3880_v26 = vld [vmem:[#allocation8 + $0x308] ss:$16 sps:$4 sm:$0xff]  }
  0xcb   : > { %v3888_v27 = vld [vmem:[#allocation8 + $0x32c] ss:$16 sps:$4 sm:$0xff]   ;;  %v3883_v28 = vld [vmem:[#allocation8 + $0x320] ss:$16 sps:$4 sm:$0xff]   ;;  %v3891_v29 = vld [vmem:[#allocation8 + $0x344] ss:$16 sps:$4 sm:$0xff]  }
  0xcc   : > { %1081 = vmatpush1.bf16.msra.mxu0 %v3859_v10  ;;  %v3886_v30 = vld [vmem:[#allocation8 + $0x328] ss:$16 sps:$4 sm:$0xff]   ;;  %v3894_v31 = vld [vmem:[#allocation8 + $0x34c] ss:$16 sps:$4 sm:$0xff]   ;;  %v3889_v32 = vld [vmem:[#allocation8 + $0x340] ss:$16 sps:$4 sm:$0xff]  }
  0xcd   : > { %1082 = vmatprep.subr.bf16.mxu0 %v3867_v14  ;;  %1167 = vmatpush1.bf16.msra.mxu1 %v3862_v13  ;;  %v3897_v33 = vld [vmem:[#allocation8 + $0x364] ss:$16 sps:$4 sm:$0xff]   ;;  %v3892_v34 = vld [vmem:[#allocation8 + $0x348] ss:$16 sps:$4 sm:$0xff]   ;;  %v3900_v35 = vld [vmem:[#allocation8 + $0x36c] ss:$16 sps:$4 sm:$0xff]  }
  0xce   : > { %1168 = vmatprep.subr.bf16.mxu1 %v3870_v16  ;;  %v3895_v36 = vld [vmem:[#allocation8 + $0x360] ss:$16 sps:$4 sm:$0xff]   ;;  %v3903_v37 = vld [vmem:[#allocation8 + $0x384] ss:$16 sps:$4 sm:$0xff]   ;;  %v3898_v38 = vld [vmem:[#allocation8 + $0x368] ss:$16 sps:$4 sm:$0xff]  }
  0xcf   : > { %v3906_v39 = vld [vmem:[#allocation8 + $0x38c] ss:$16 sps:$4 sm:$0xff]   ;;  %v3901_v40 = vld [vmem:[#allocation8 + $0x380] ss:$16 sps:$4 sm:$0xff]   ;;  %v3909_v41 = vld [vmem:[#allocation8 + $0x3a4] ss:$16 sps:$4 sm:$0xff]  }
  0xd0   : > { %1083 = vmatpush1.bf16.msra.mxu0 %v3865_v15  ;;  %v3904_v42 = vld [vmem:[#allocation8 + $0x388] ss:$16 sps:$4 sm:$0xff]   ;;  %v3912_v43 = vld [vmem:[#allocation8 + $0x3ac] ss:$16 sps:$4 sm:$0xff]   ;;  %v3907_v44 = vld [vmem:[#allocation8 + $0x3a0] ss:$16 sps:$4 sm:$0xff]  }
  0xd1   : > { %1084 = vmatprep.subr.bf16.mxu0 %v3873_v17  ;;  %1169 = vmatpush1.bf16.msra.mxu1 %v3868_v18  ;;  %v3915_v45 = vld [vmem:[#allocation8 + $0x3c4] ss:$16 sps:$4 sm:$0xff]   ;;  %v3910_v46 = vld [vmem:[#allocation8 + $0x3a8] ss:$16 sps:$4 sm:$0xff]   ;;  %v3918_v47 = vld [vmem:[#allocation8 + $0x3cc] ss:$16 sps:$4 sm:$0xff]  }
  0xd2   : > { %1170 = vmatprep.subr.bf16.mxu1 %v3876_v19  ;;  %v3913_v48 = vld [vmem:[#allocation8 + $0x3c0] ss:$16 sps:$4 sm:$0xff]   ;;  %v3921_v49 = vld [vmem:[#allocation8 + $0x3e4] ss:$16 sps:$4 sm:$0xff]   ;;  %v3916_v50 = vld [vmem:[#allocation8 + $0x3c8] ss:$16 sps:$4 sm:$0xff]  }
  0xd3   : > { %v3924_v51 = vld [vmem:[#allocation8 + $0x3ec] ss:$16 sps:$4 sm:$0xff]   ;;  %v3919_v52 = vld [vmem:[#allocation8 + $0x3e0] ss:$16 sps:$4 sm:$0xff]   ;;  %v3927_v53 = vld [vmem:[#allocation8 + $0x404] ss:$16 sps:$4 sm:$0xff]  }
  0xd4   : > { %1085 = vmatpush1.bf16.msra.mxu0 %v3871_v20  ;;  %v3922_v54 = vld [vmem:[#allocation8 + $0x3e8] ss:$16 sps:$4 sm:$0xff]   ;;  %v3930_v55 = vld [vmem:[#allocation8 + $0x40c] ss:$16 sps:$4 sm:$0xff]   ;;  %v3925_v56 = vld [vmem:[#allocation8 + $0x400] ss:$16 sps:$4 sm:$0xff]  }
  0xd5   : > { %1086 = vmatprep.subr.bf16.mxu0 %v3879_v21  ;;  %1171 = vmatpush1.bf16.msra.mxu1 %v3874_v22  ;;  %v3933_v57 = vld [vmem:[#allocation8 + $0x424] ss:$16 sps:$4 sm:$0xff]   ;;  %v3928_v58 = vld [vmem:[#allocation8 + $0x408] ss:$16 sps:$4 sm:$0xff]   ;;  %v3936_v59 = vld [vmem:[#allocation8 + $0x42c] ss:$16 sps:$4 sm:$0xff]  }
  0xd6   : > { %1172 = vmatprep.subr.bf16.mxu1 %v3882_v23  ;;  %v3931_v60 = vld [vmem:[#allocation8 + $0x420] ss:$16 sps:$4 sm:$0xff]   ;;  %v3939_v61 = vld [vmem:[#allocation8 + $0x444] ss:$16 sps:$4 sm:$0xff]   ;;  %v3934_v62 = vld [vmem:[#allocation8 + $0x428] ss:$16 sps:$4 sm:$0xff]  }
  0xd7   : > { %v3942_v63 = vld [vmem:[#allocation8 + $0x44c] ss:$16 sps:$4 sm:$0xff]   ;;  %v3937_v2 = vld [vmem:[#allocation8 + $0x440] ss:$16 sps:$4 sm:$0xff]   ;;  %v3945_v4 = vld [vmem:[#allocation8 + $0x464] ss:$16 sps:$4 sm:$0xff]  }
  0xd8   : > { %1087 = vmatpush1.bf16.msra.mxu0 %v3877_v24  ;;  %v3940_v6 = vld [vmem:[#allocation8 + $0x448] ss:$16 sps:$4 sm:$0xff]   ;;  %v3948_v7 = vld [vmem:[#allocation8 + $0x46c] ss:$16 sps:$4 sm:$0xff]   ;;  %v3943_v8 = vld [vmem:[#allocation8 + $0x460] ss:$16 sps:$4 sm:$0xff]  }
  0xd9   : > { %1088 = vmatprep.subr.bf16.mxu0 %v3885_v25  ;;  %1173 = vmatpush1.bf16.msra.mxu1 %v3880_v26  ;;  %v3951_v9 = vld [vmem:[#allocation8 + $0x484] ss:$16 sps:$4 sm:$0xff]   ;;  %v3946_v10 = vld [vmem:[#allocation8 + $0x468] ss:$16 sps:$4 sm:$0xff]   ;;  %v3954_v11 = vld [vmem:[#allocation8 + $0x48c] ss:$16 sps:$4 sm:$0xff]  }
  0xda   : > { %1174 = vmatprep.subr.bf16.mxu1 %v3888_v27  ;;  %v3949_v12 = vld [vmem:[#allocation8 + $0x480] ss:$16 sps:$4 sm:$0xff]   ;;  %v3957_v13 = vld [vmem:[#allocation8 + $0x4a4] ss:$16 sps:$4 sm:$0xff]   ;;  %v3952_v14 = vld [vmem:[#allocation8 + $0x488] ss:$16 sps:$4 sm:$0xff]  }
  0xdb   : > { %v3960_v15 = vld [vmem:[#allocation8 + $0x4ac] ss:$16 sps:$4 sm:$0xff]   ;;  %v3955_v16 = vld [vmem:[#allocation8 + $0x4a0] ss:$16 sps:$4 sm:$0xff]   ;;  %v3963_v17 = vld [vmem:[#allocation8 + $0x4c4] ss:$16 sps:$4 sm:$0xff]  }
  0xdc   : > { %1089 = vmatpush1.bf16.msra.mxu0 %v3883_v28  ;;  %v3958_v18 = vld [vmem:[#allocation8 + $0x4a8] ss:$16 sps:$4 sm:$0xff]   ;;  %v3966_v19 = vld [vmem:[#allocation8 + $0x4cc] ss:$16 sps:$4 sm:$0xff]   ;;  %v3961_v20 = vld [vmem:[#allocation8 + $0x4c0] ss:$16 sps:$4 sm:$0xff]  }
  0xdd   : > { %1090 = vmatprep.subr.bf16.mxu0 %v3891_v29  ;;  %1175 = vmatpush1.bf16.msra.mxu1 %v3886_v30  ;;  %v3969_v21 = vld [vmem:[#allocation8 + $0x4e4] ss:$16 sps:$4 sm:$0xff]   ;;  %v3964_v22 = vld [vmem:[#allocation8 + $0x4c8] ss:$16 sps:$4 sm:$0xff]   ;;  %v3972_v23 = vld [vmem:[#allocation8 + $0x4ec] ss:$16 sps:$4 sm:$0xff]  }
  0xde   : > { %1176 = vmatprep.subr.bf16.mxu1 %v3894_v31  ;;  %v3967_v24 = vld [vmem:[#allocation8 + $0x4e0] ss:$16 sps:$4 sm:$0xff]   ;;  %v3970_v25 = vld [vmem:[#allocation8 + $0x4e8] ss:$16 sps:$4 sm:$0xff]   ;;  %v3978_v26 = vld [vmem:[#allocation8 + $0xc] ss:$16 sps:$4 sm:$0xff]  }
  0xdf   : > { %v3973_v27 = vld [vmem:[#allocation8] ss:$16 sps:$4 sm:$0xff]   ;;  %v3981_v28 = vld [vmem:[#allocation8 + $0x24] ss:$16 sps:$4 sm:$0xff]   ;;  %v3976_v29 = vld [vmem:[#allocation8 + $0x8] ss:$16 sps:$4 sm:$0xff]  }
  0xe0   : > { %1091 = vmatpush1.bf16.msra.mxu0 %v3889_v32  ;;  %v3984_v30 = vld [vmem:[#allocation8 + $0x2c] ss:$16 sps:$4 sm:$0xff]   ;;  %v3979_v31 = vld [vmem:[#allocation8 + $0x20] ss:$16 sps:$4 sm:$0xff]   ;;  %v3987_v32 = vld [vmem:[#allocation8 + $0x44] ss:$16 sps:$4 sm:$0xff]  }
  0xe1   : > { %1092 = vmatprep.subr.bf16.mxu0 %v3897_v33  ;;  %1177 = vmatpush1.bf16.msra.mxu1 %v3892_v34  ;;  %v3982_v33 = vld [vmem:[#allocation8 + $0x28] ss:$16 sps:$4 sm:$0xff]   ;;  %v3990_v34 = vld [vmem:[#allocation8 + $0x4c] ss:$16 sps:$4 sm:$0xff]   ;;  %s3109_s17 = sshll.u32 %s4923_s29, 4  ;;  %s3080_s19 = scalar_lea.sflag [#allocation13], %s4825_s14  ;;  %s4968_s17 = int_to_ptr.vmem [resolvable:$true] %s3109_s17 }
  0xe2   : > { %1178 = vmatprep.subr.bf16.mxu1 %v3900_v35  ;;  %v3985_v35 = vld [vmem:[#allocation8 + $0x40] ss:$16 sps:$4 sm:$0xff]   ;;  %s4418_s4 = scalar_lea.vmem %s4968_s17, 256  ;;  %s4546_s18 = smov [#allocation12]  }
  0xe3   : > { %p4419_p2 = scmp.ne.s32.totalorder %s4968_s17, %s4418_s4  ;;  %s4422_s8 = sshll.u32 %s4546_s18, 4  ;;  %s4423_s8 = int_to_ptr.vmem [resolvable:$false] %s4422_s8 }
  0xe4   : > { %1093 = vmatpush1.bf16.msra.mxu0 %v3895_v36  ;;  %v3993_v36 = vld [vmem:[#allocation8 + $0x64] ss:$16 sps:$4 sm:$0xff]   ;;  %s4424_s16 = scalar_lea.vmem %s4423_s8, 512  ;;  %p4425_p8 = scmp.lt.s32.totalorder %s4968_s17, %s4423_s8 }
  0xe5   : > { %1094 = vmatprep.subr.bf16.mxu0 %v3903_v37  ;;  %1179 = vmatpush1.bf16.msra.mxu1 %v3898_v38  ;;  %v3988_v37 = vld [vmem:[#allocation8 + $0x48] ss:$16 sps:$4 sm:$0xff]   ;;  %v3996_v38 = vld [vmem:[#allocation8 + $0x6c] ss:$16 sps:$4 sm:$0xff]   ;;  %p4420_p4 = pnand %p4419_p2, %p4738_p5  ;;  %p4426_p6 = scmp.lt.s32.totalorder %s4424_s16, %s4418_s4 }
  0xe6   : > { %1180 = vmatprep.subr.bf16.mxu1 %v3906_v39  ;;  %v3991_v39 = vld [vmem:[#allocation8 + $0x60] ss:$16 sps:$4 sm:$0xff]  }
  0xe7   : > { %p4421_p0 = pneg %p4420_p4  ;;  %p4427_p10 = por %p4426_p6, %p4425_p8 }
  0xe8   : > { %1095 = vmatpush1.bf16.msra.mxu0 %v3901_v40  ;;  %v3999_v40 = vld [vmem:[#allocation8 + $0x84] ss:$16 sps:$4 sm:$0xff]  }
  0xe9   : > { %1096 = vmatprep.subr.bf16.mxu0 %v3909_v41  ;;  %1181 = vmatpush1.bf16.msra.mxu1 %v3904_v42  ;;  %v4002_v41 = vld [vmem:[#allocation8 + $0x8c] ss:$16 sps:$4 sm:$0xff]   ;;  %v3997_v42 = vld [vmem:[#allocation8 + $0x80] ss:$16 sps:$4 sm:$0xff]   ;;  %p4428_p3 = pnand %p4427_p10, %p4421_p0 }
  0xea   : > { %1182 = vmatprep.subr.bf16.mxu1 %v3912_v43  ;;  %v4005_v43 = vld [vmem:[#allocation8 + $0xa4] ss:$16 sps:$4 sm:$0xff]  }
  0xec   : > { %1097 = vmatpush1.bf16.msra.mxu0 %v3907_v44  ;;  %v4000_v44 = vld [vmem:[#allocation8 + $0x88] ss:$16 sps:$4 sm:$0xff]  }
  0xed   : > { %1098 = vmatprep.subr.bf16.mxu0 %v3915_v45  ;;  %1183 = vmatpush1.bf16.msra.mxu1 %v3910_v46  ;;  %v4008_v45 = vld [vmem:[#allocation8 + $0xac] ss:$16 sps:$4 sm:$0xff]   ;;  %v4003_v46 = vld [vmem:[#allocation8 + $0xa0] ss:$16 sps:$4 sm:$0xff]  }
  0xee   : > { %1184 = vmatprep.subr.bf16.mxu1 %v3918_v47  ;;  %v4011_v47 = vld [vmem:[#allocation8 + $0xc4] ss:$16 sps:$4 sm:$0xff]  }
  0xf0   : > { %1099 = vmatpush1.bf16.msra.mxu0 %v3913_v48  ;;  %v4006_v48 = vld [vmem:[#allocation8 + $0xa8] ss:$16 sps:$4 sm:$0xff]  }
  0xf1   : > { %1100 = vmatprep.subr.bf16.mxu0 %v3921_v49  ;;  %1185 = vmatpush1.bf16.msra.mxu1 %v3916_v50  ;;  %v4014_v49 = vld [vmem:[#allocation8 + $0xcc] ss:$16 sps:$4 sm:$0xff]   ;;  %v4009_v50 = vld [vmem:[#allocation8 + $0xc0] ss:$16 sps:$4 sm:$0xff]  }
  0xf2   : > { %1186 = vmatprep.subr.bf16.mxu1 %v3924_v51  ;;  %v4012_v51 = vld [vmem:[#allocation8 + $0xc8] ss:$16 sps:$4 sm:$0xff]  }
  0xf4   : > { %1101 = vmatpush1.bf16.msra.mxu0 %v3919_v52  ;;  %v4017_v52 = vld [vmem:[#allocation8 + $0xe4] ss:$16 sps:$4 sm:$0xff]  }
  0xf5   : > { %1102 = vmatprep.subr.bf16.mxu0 %v3927_v53  ;;  %1187 = vmatpush1.bf16.msra.mxu1 %v3922_v54  ;;  %v4015_v53 = vld [vmem:[#allocation8 + $0xe0] ss:$16 sps:$4 sm:$0xff]   ;;  %v4020_v54 = vld [vmem:[#allocation8 + $0xec] ss:$16 sps:$4 sm:$0xff]  }
  0xf6   : > { %1188 = vmatprep.subr.bf16.mxu1 %v3930_v55  ;;  %v4023_v55 = vld [vmem:[#allocation8 + $0x104] ss:$16 sps:$4 sm:$0xff]  }
  0xf8   : > { %1103 = vmatpush1.bf16.msra.mxu0 %v3925_v56  ;;  %v4018_v56 = vld [vmem:[#allocation8 + $0xe8] ss:$16 sps:$4 sm:$0xff]  }
  0xf9   : > { %1104 = vmatprep.subr.bf16.mxu0 %v3933_v57  ;;  %1189 = vmatpush1.bf16.msra.mxu1 %v3928_v58  ;;  %v4021_v57 = vld [vmem:[#allocation8 + $0x100] ss:$16 sps:$4 sm:$0xff]   ;;  %v4026_v58 = vld [vmem:[#allocation8 + $0x10c] ss:$16 sps:$4 sm:$0xff]  }
  0xfa   : > { %1190 = vmatprep.subr.bf16.mxu1 %v3936_v59  ;;  %v4029_v59 = vld [vmem:[#allocation8 + $0x124] ss:$16 sps:$4 sm:$0xff]  }
  0xfc   : > { %1105 = vmatpush1.bf16.msra.mxu0 %v3931_v60  ;;  %v4024_v60 = vld [vmem:[#allocation8 + $0x108] ss:$16 sps:$4 sm:$0xff]  }
  0xfd   : > { %1106 = vmatprep.subr.bf16.mxu0 %v3939_v61  ;;  %1191 = vmatpush1.bf16.msra.mxu1 %v3934_v62  ;;  %v4032_v61 = vld [vmem:[#allocation8 + $0x12c] ss:$16 sps:$4 sm:$0xff]   ;;  %v4027_v62 = vld [vmem:[#allocation8 + $0x120] ss:$16 sps:$4 sm:$0xff]  }
  0xfe   : > { %1192 = vmatprep.subr.bf16.mxu1 %v3942_v63  ;;  %v4035_v63 = vld [vmem:[#allocation8 + $0x144] ss:$16 sps:$4 sm:$0xff]  }
 0x100   : > { %1107 = vmatpush1.bf16.msra.mxu0 %v3937_v2  ;;  %v4030_v2 = vld [vmem:[#allocation8 + $0x128] ss:$16 sps:$4 sm:$0xff]  }
 0x101   : > { %1108 = vmatprep.subr.bf16.mxu0 %v3945_v4  ;;  %1193 = vmatpush1.bf16.msra.mxu1 %v3940_v6  ;;  %v4038_v4 = vld [vmem:[#allocation8 + $0x14c] ss:$16 sps:$4 sm:$0xff]   ;;  %v4033_v6 = vld [vmem:[#allocation8 + $0x140] ss:$16 sps:$4 sm:$0xff]  }
 0x102   : > { %1194 = vmatprep.subr.bf16.mxu1 %v3948_v7  ;;  %v4041_v7 = vld [vmem:[#allocation8 + $0x164] ss:$16 sps:$4 sm:$0xff]  }
 0x104   : > { %1109 = vmatpush1.bf16.msra.mxu0 %v3943_v8  ;;  %v4036_v8 = vld [vmem:[#allocation8 + $0x148] ss:$16 sps:$4 sm:$0xff]  }
 0x105   : > { %1121 = vmatprep.subr.bf16.mxu0 %v3951_v9  ;;  %1195 = vmatpush1.bf16.msra.mxu1 %v3946_v10  ;;  %v4044_v9 = vld [vmem:[#allocation8 + $0x16c] ss:$16 sps:$4 sm:$0xff]   ;;  %v4039_v10 = vld [vmem:[#allocation8 + $0x160] ss:$16 sps:$4 sm:$0xff]  }
 0x106   : > { %1207 = vmatprep.subr.bf16.mxu1 %v3954_v11  ;;  %v4047_v11 = vld [vmem:[#allocation8 + $0x184] ss:$16 sps:$4 sm:$0xff]  }
 0x107   : > { %1111 = vmatmul.mubr.bf16.vlgmr.msra.gmra.mrb[4].mxu0 %v4858_v3 }
 0x108   : > { %1122 = vmatpush1.bf16.msra.mxu0 %v3949_v12  ;;  %1153 = vmatprep.mubr.bf16.mxu0 %v4543_v0  ;;  %v4042_v12 = vld [vmem:[#allocation8 + $0x168] ss:$16 sps:$4 sm:$0xff]  }
 0x109   : > { %1197 = vmatmul.mubr.bf16.vlgmr.msra.gmra.mrb[4].mxu1 %v4858_v3  ;;  %1123 = vmatprep.subr.bf16.mxu0 %v3957_v13  ;;  %v3975_v3 = vld [vmem:[#allocation8 + $0x4] ss:$16 sps:$4 sm:$0xff]   ;;  %v4045_v13 = vld [vmem:[#allocation8 + $0x180] ss:$16 sps:$4 sm:$0xff]  }
 0x10a   : > { %1208 = vmatpush1.bf16.msra.mxu1 %v3952_v14  ;;  %1239 = vmatprep.mubr.bf16.mxu1 %v4543_v0  ;;  %v4050_v14 = vld [vmem:[#allocation8 + $0x18c] ss:$16 sps:$4 sm:$0xff]  }
 0x10b   : > { %1209 = vmatprep.subr.bf16.mxu1 %v3960_v15  ;;  %v4053_v15 = vld [vmem:[#allocation8 + $0x1a4] ss:$16 sps:$4 sm:$0xff]  }
 0x10c   : > { %1124 = vmatpush1.bf16.msra.mxu0 %v3955_v16  ;;  %v4048_v16 = vld [vmem:[#allocation8 + $0x188] ss:$16 sps:$4 sm:$0xff]  }
 0x10d   : > { %1125 = vmatprep.subr.bf16.mxu0 %v3963_v17  ;;  %v4051_v17 = vld [vmem:[#allocation8 + $0x1a0] ss:$16 sps:$4 sm:$0xff]  }
 0x10e   : > { %1210 = vmatpush1.bf16.msra.mxu1 %v3958_v18  ;;  %v4056_v18 = vld [vmem:[#allocation8 + $0x1ac] ss:$16 sps:$4 sm:$0xff]  }
 0x10f   : > { %1211 = vmatprep.subr.bf16.mxu1 %v3966_v19  ;;  %v4059_v19 = vld [vmem:[#allocation8 + $0x1c4] ss:$16 sps:$4 sm:$0xff]  }
 0x110   : > { %1126 = vmatpush1.bf16.msra.mxu0 %v3961_v20  ;;  %v4054_v20 = vld [vmem:[#allocation8 + $0x1a8] ss:$16 sps:$4 sm:$0xff]  }
 0x111   : > { %1127 = vmatprep.subr.bf16.mxu0 %v3969_v21  ;;  %v4057_v21 = vld [vmem:[#allocation8 + $0x1c0] ss:$16 sps:$4 sm:$0xff]  }
 0x112   : > { %1212 = vmatpush1.bf16.msra.mxu1 %v3964_v22  ;;  %v4062_v22 = vld [vmem:[#allocation8 + $0x1cc] ss:$16 sps:$4 sm:$0xff]  }
 0x113   : > { %1213 = vmatprep.subr.bf16.mxu1 %v3972_v23  ;;  %v4065_v23 = vld [vmem:[#allocation8 + $0x1e4] ss:$16 sps:$4 sm:$0xff]  }
 0x114   : > { %1128 = vmatpush1.bf16.msra.mxu0 %v3967_v24  ;;  %v4060_v24 = vld [vmem:[#allocation8 + $0x1c8] ss:$16 sps:$4 sm:$0xff]  }
 0x115   : > { %1653 = vmatprep.subr.bf16.mxu0 %v3975_v3  ;;  %v4063_v3 = vld [vmem:[#allocation8 + $0x1e0] ss:$16 sps:$4 sm:$0xff]  }
 0x116   : > { %1214 = vmatpush1.bf16.msra.mxu1 %v3970_v25  ;;  %v4068_v25 = vld [vmem:[#allocation8 + $0x1ec] ss:$16 sps:$4 sm:$0xff]  }
 0x117   : > { %1739 = vmatprep.subr.bf16.mxu1 %v3978_v26  ;;  %3368 = vmatmul.mubr.msk.bf16.vlgmr.msra.gmra.mrb[4].mxu0 %vm1074_vm2, %v4862_v5  ;;  %v4071_v26 = vld [vmem:[#allocation8 + $0x204] ss:$16 sps:$4 sm:$0xff]  }
 0x118   : > { %1654 = vmatpush1.bf16.msra.mxu0 %v3973_v27  ;;  %v4066_v27 = vld [vmem:[#allocation8 + $0x1e8] ss:$16 sps:$4 sm:$0xff]  }
 0x119   : > { %3369 = vmatmul.mubr.msk.bf16.vlgmr.msra.gmra.mrb[4].mxu1 %vm1074_vm2, %v4862_v5  ;;  %1655 = vmatprep.subr.bf16.mxu0 %v3981_v28  ;;  %v3994_v5 = vld [vmem:[#allocation8 + $0x68] ss:$16 sps:$4 sm:$0xff]   ;;  %v4074_v28 = vld [vmem:[#allocation8 + $0x20c] ss:$16 sps:$4 sm:$0xff]  }
 0x11a   : > { %1740 = vmatpush1.bf16.msra.mxu1 %v3976_v29 }
 0x11b   : > { %1741 = vmatprep.subr.bf16.mxu1 %v3984_v30 }
 0x11c   : > { %1656 = vmatpush1.bf16.msra.mxu0 %v3979_v31 }
 0x11d   : > { %1657 = vmatprep.subr.bf16.mxu0 %v3987_v32 }
 0x11e   : > { %1742 = vmatpush1.bf16.msra.mxu1 %v3982_v33 }
 0x11f   : > { %1743 = vmatprep.subr.bf16.mxu1 %v3990_v34 }
 0x120   : > { %1658 = vmatpush1.bf16.msra.mxu0 %v3985_v35 }
 0x121   : > { %1659 = vmatprep.subr.bf16.mxu0 %v3993_v36 }
 0x122   : > { %1744 = vmatpush1.bf16.msra.mxu1 %v3988_v37  ;;  %v4069_v37 = vld [vmem:[#allocation8 + $0x200] ss:$16 sps:$4 sm:$0xff]  }
 0x123   : > { %1745 = vmatprep.subr.bf16.mxu1 %v3996_v38  ;;  %v4072_v38 = vld [vmem:[#allocation8 + $0x208] ss:$16 sps:$4 sm:$0xff]  }
 0x124   : > { %1660 = vmatpush1.bf16.msra.mxu0 %v3991_v39 }
 0x125   : > { %1661 = vmatprep.subr.bf16.mxu0 %v3999_v40  ;;  %v4077_v40 = vld [vmem:[#allocation8 + $0x224] ss:$16 sps:$4 sm:$0xff]  }
 0x126   : > { %1746 = vmatpush1.bf16.msra.mxu1 %v3994_v5  ;;  %v4080_v5 = vld [vmem:[#allocation8 + $0x22c] ss:$16 sps:$4 sm:$0xff]  }
 0x127   : > { %1747 = vmatprep.subr.bf16.mxu1 %v4002_v41 }
 0x128   : > { %1662 = vmatpush1.bf16.msra.mxu0 %v3997_v42 }
 0x129   : > { %1663 = vmatprep.subr.bf16.mxu0 %v4005_v43  ;;  %v4075_v43 = vld [vmem:[#allocation8 + $0x220] ss:$16 sps:$4 sm:$0xff]  }
 0x12a   : > { %1748 = vmatpush1.bf16.msra.mxu1 %v4000_v44  ;;  %v4078_v44 = vld [vmem:[#allocation8 + $0x228] ss:$16 sps:$4 sm:$0xff]  }
 0x12b   : > { %1749 = vmatprep.subr.bf16.mxu1 %v4008_v45  ;;  %v4083_v45 = vld [vmem:[#allocation8 + $0x244] ss:$16 sps:$4 sm:$0xff]  }
 0x12c   : > { %1664 = vmatpush1.bf16.msra.mxu0 %v4003_v46  ;;  %v4086_v46 = vld [vmem:[#allocation8 + $0x24c] ss:$16 sps:$4 sm:$0xff]  }
 0x12d   : > { %1665 = vmatprep.subr.bf16.mxu0 %v4011_v47  ;;  %v4081_v47 = vld [vmem:[#allocation8 + $0x240] ss:$16 sps:$4 sm:$0xff]  }
 0x12e   : > { %1750 = vmatpush1.bf16.msra.mxu1 %v4006_v48  ;;  %v4084_v48 = vld [vmem:[#allocation8 + $0x248] ss:$16 sps:$4 sm:$0xff]  }
 0x12f   : > { %1751 = vmatprep.subr.bf16.mxu1 %v4014_v49  ;;  %v4089_v49 = vld [vmem:[#allocation8 + $0x264] ss:$16 sps:$4 sm:$0xff]  }
 0x130   : > { %1666 = vmatpush1.bf16.msra.mxu0 %v4009_v50  ;;  %v4092_v50 = vld [vmem:[#allocation8 + $0x26c] ss:$16 sps:$4 sm:$0xff]  }
 0x131   : > { %1667 = vmatprep.subr.bf16.mxu0 %v4017_v52  ;;  %v4090_v52 = vld [vmem:[#allocation8 + $0x268] ss:$16 sps:$4 sm:$0xff]  }
 0x132   : > { %1752 = vmatpush1.bf16.msra.mxu1 %v4012_v51  ;;  %v4087_v51 = vld [vmem:[#allocation8 + $0x260] ss:$16 sps:$4 sm:$0xff]  }
 0x133   : > { %1753 = vmatprep.subr.bf16.mxu1 %v4020_v54  ;;  %v4270_v54 = vld [vmem:[%s4829_s23 + $0x4] ss:$12 sps:$4 sm:$0xff]  }
 0x134   : > { %1668 = vmatpush1.bf16.msra.mxu0 %v4015_v53  ;;  %v4099_v53 = vld [vmem:[#allocation8 + $0x50c] ss:$16 sps:$4 sm:$0xff]  }
 0x135   : > { %1669 = vmatprep.subr.bf16.mxu0 %v4023_v55  ;;  %v4097_v55 = vld [vmem:[#allocation8 + $0x508] ss:$16 sps:$4 sm:$0xff]  }
 0x136   : > { %1754 = vmatpush1.bf16.msra.mxu1 %v4018_v56  ;;  %v4105_v56 = vld [vmem:[#allocation8 + $0x52c] ss:$16 sps:$4 sm:$0xff]  }
 0x137   : > { %1755 = vmatprep.subr.bf16.mxu1 %v4026_v58  ;;  %v4103_v58 = vld [vmem:[#allocation8 + $0x528] ss:$16 sps:$4 sm:$0xff]  }
 0x138   : > { %1670 = vmatpush1.bf16.msra.mxu0 %v4021_v57  ;;  %v4271_v57 = vld [vmem:[%s4829_s23] ss:$12 sps:$4 sm:$0xff]  }
 0x139   : > { %1671 = vmatprep.subr.bf16.mxu0 %v4029_v59  ;;  %v4111_v59 = vld [vmem:[#allocation8 + $0x54c] ss:$16 sps:$4 sm:$0xff]  }
 0x13a   : > { %1756 = vmatpush1.bf16.msra.mxu1 %v4024_v60  ;;  %v4883_v60 = vld [vmem:[#allocation7 + $0x10] sm:$0xff]  }
 0x13b   : > { %1757 = vmatprep.subr.bf16.mxu1 %v4032_v61  ;;  %v4096_v61 = vld [vmem:[#allocation8 + $0x504] ss:$16 sps:$4 sm:$0xff]  }
 0x13c   : > { %1672 = vmatpush1.bf16.msra.mxu0 %v4027_v62  ;;  %v4109_v62 = vld [vmem:[#allocation8 + $0x548] ss:$16 sps:$4 sm:$0xff]  }
 0x13d   : > { %1673 = vmatprep.subr.bf16.mxu0 %v4035_v63  ;;  %v4117_v63 = vld [vmem:[#allocation8 + $0x56c] ss:$16 sps:$4 sm:$0xff]  }
 0x13e   : > { %1758 = vmatpush1.bf16.msra.mxu1 %v4030_v2  ;;  %v4272_v2 = vld [vmem:[%s4829_s23 + $0x8] ss:$12 sps:$4 sm:$0xff]  }
 0x13f   : > { %1759 = vmatprep.subr.bf16.mxu1 %v4038_v4  ;;  %v4115_v4 = vld [vmem:[#allocation8 + $0x568] ss:$16 sps:$4 sm:$0xff]  }
 0x140   : > { %1674 = vmatpush1.bf16.msra.mxu0 %v4033_v6  ;;  %v4123_v6 = vld [vmem:[#allocation8 + $0x58c] ss:$16 sps:$4 sm:$0xff]  }
 0x141   : > { %1675 = vmatprep.subr.bf16.mxu0 %v4041_v7  ;;  %v4094_v7 = vld [vmem:[#allocation8 + $0x500] ss:$16 sps:$4 sm:$0xff]  }
 0x142   : > { %1760 = vmatpush1.bf16.msra.mxu1 %v4036_v8  ;;  %v4102_v8 = vld [vmem:[#allocation8 + $0x524] ss:$16 sps:$4 sm:$0xff]  }
 0x143   : > { %1761 = vmatprep.subr.bf16.mxu1 %v4044_v9  ;;  %v4121_v9 = vld [vmem:[#allocation8 + $0x588] ss:$16 sps:$4 sm:$0xff]  }
 0x144   : > { %1676 = vmatpush1.bf16.msra.mxu0 %v4039_v10  ;;  %v4129_v10 = vld [vmem:[#allocation8 + $0x5ac] ss:$16 sps:$4 sm:$0xff]  }
 0x145   : > { %1677 = vmatprep.subr.bf16.mxu0 %v4047_v11  ;;  %v4100_v11 = vld [vmem:[#allocation8 + $0x520] ss:$16 sps:$4 sm:$0xff]  }
 0x146   : > { %1762 = vmatpush1.bf16.msra.mxu1 %v4042_v12  ;;  %v4108_v12 = vld [vmem:[#allocation8 + $0x544] ss:$16 sps:$4 sm:$0xff]  }
 0x147   : > { %1763 = vmatprep.subr.bf16.mxu1 %v4050_v14  ;;  %v4135_v14 = vld [vmem:[#allocation8 + $0x5cc] ss:$16 sps:$4 sm:$0xff]  }
 0x148   : > { %1678 = vmatpush1.bf16.msra.mxu0 %v4045_v13  ;;  %v4127_v13 = vld [vmem:[#allocation8 + $0x5a8] ss:$16 sps:$4 sm:$0xff]  }
 0x149   : > { %1679 = vmatprep.subr.bf16.mxu0 %v4053_v15  ;;  %v4106_v15 = vld [vmem:[#allocation8 + $0x540] ss:$16 sps:$4 sm:$0xff]  }
 0x14a   : > { %1764 = vmatpush1.bf16.msra.mxu1 %v4048_v16  ;;  %v4114_v16 = vld [vmem:[#allocation8 + $0x564] ss:$16 sps:$4 sm:$0xff]  }
 0x14b   : > { %1765 = vmatprep.subr.bf16.mxu1 %v4056_v18  ;;  %v4141_v18 = vld [vmem:[#allocation8 + $0x5ec] ss:$16 sps:$4 sm:$0xff]  }
 0x14c   : > { %1680 = vmatpush1.bf16.msra.mxu0 %v4051_v17  ;;  %v4133_v17 = vld [vmem:[#allocation8 + $0x5c8] ss:$16 sps:$4 sm:$0xff]  }
 0x14d   : > { %1681 = vmatprep.subr.bf16.mxu0 %v4059_v19  ;;  %v4112_v19 = vld [vmem:[#allocation8 + $0x560] ss:$16 sps:$4 sm:$0xff]  }
 0x14e   : > { %1766 = vmatpush1.bf16.msra.mxu1 %v4054_v20  ;;  %v4120_v20 = vld [vmem:[#allocation8 + $0x584] ss:$16 sps:$4 sm:$0xff]  }
 0x14f   : > { %1767 = vmatprep.subr.bf16.mxu1 %v4062_v22  ;;  %v4147_v22 = vld [vmem:[#allocation8 + $0x60c] ss:$16 sps:$4 sm:$0xff]  }
 0x150   : > { %1682 = vmatpush1.bf16.msra.mxu0 %v4057_v21  ;;  %v4139_v21 = vld [vmem:[#allocation8 + $0x5e8] ss:$16 sps:$4 sm:$0xff]  }
 0x151   : > { %1683 = vmatprep.subr.bf16.mxu0 %v4065_v23  ;;  %v4118_v23 = vld [vmem:[#allocation8 + $0x580] ss:$16 sps:$4 sm:$0xff]  }
 0x152   : > { %1768 = vmatpush1.bf16.msra.mxu1 %v4060_v24  ;;  %v4126_v24 = vld [vmem:[#allocation8 + $0x5a4] ss:$16 sps:$4 sm:$0xff]  }
 0x153   : > { %1769 = vmatprep.subr.bf16.mxu1 %v4068_v25  ;;  %v4153_v25 = vld [vmem:[#allocation8 + $0x62c] ss:$16 sps:$4 sm:$0xff]  }
 0x154   : > { %1684 = vmatpush1.bf16.msra.mxu0 %v4063_v3  ;;  %v4145_v3 = vld [vmem:[#allocation8 + $0x608] ss:$16 sps:$4 sm:$0xff]  }
 0x155   : > { %1696 = vmatprep.subr.bf16.mxu0 %v4071_v26  ;;  %v4124_v26 = vld [vmem:[#allocation8 + $0x5a0] ss:$16 sps:$4 sm:$0xff]  }
 0x156   : > { %1770 = vmatpush1.bf16.msra.mxu1 %v4066_v27  ;;  %v4132_v27 = vld [vmem:[#allocation8 + $0x5c4] ss:$16 sps:$4 sm:$0xff]  }
 0x157   : > { %1782 = vmatprep.subr.bf16.mxu1 %v4074_v28  ;;  %v4151_v28 = vld [vmem:[#allocation8 + $0x628] ss:$16 sps:$4 sm:$0xff]  }
 0x19a   : > { %v460_v29 = vpop.f32.mrb[0].mxu0  ;;  %v503_v32 = vpop.f32.mrb[0].mxu1 }
 0x19b   : > { %v462_v30 = vpop.f32.mrb[1].mxu0  ;;  %v3619_v35 = vpop.f32.mrb[1].mxu1 }
 0x19c   : > { %v464_v31 = vpop.f32.mrb[2].mxu0  ;;  %v506_v39 = vpop.f32.mrb[2].mxu1  ;;  %v4144_v35 = vld [vmem:[#allocation8 + $0x604] ss:$16 sps:$4 sm:$0xff]  }
 0x19d   : > { %v510_v33 = vpack.c.bf16 %v464_v31, %v460_v29  ;;  %v466_v34 = vpop.f32.mrb[3].mxu0  ;;  %v512_v41 = vpack.c.bf16 %v506_v39, %v503_v32  ;;  %v3620_v42 = vpop.f32.mrb[3].mxu1  ;;  %v4159_v29 = vld [vmem:[#allocation8 + $0x64c] ss:$16 sps:$4 sm:$0xff]   ;;  %v4138_v31 = vld [vmem:[#allocation8 + $0x5e4] ss:$16 sps:$4 sm:$0xff]  }
 0x19e   : > { %v511_v36 = vpack.c.bf16 %v466_v34, %v462_v30  ;;  %v4130_v30 = vld [vmem:[#allocation8 + $0x5c0] ss:$16 sps:$4 sm:$0xff]   ;;  %v4157_v32 = vld [vmem:[#allocation8 + $0x648] ss:$16 sps:$4 sm:$0xff]   ;;  %v4150_v39 = vld [vmem:[#allocation8 + $0x624] ss:$16 sps:$4 sm:$0xff]  }
 0x19f   : > { %v4136_v34 = vld [vmem:[#allocation8 + $0x5e0] ss:$16 sps:$4 sm:$0xff]   ;;  %v4156_v42 = vld [vmem:[#allocation8 + $0x644] ss:$16 sps:$4 sm:$0xff]  }
 0x1a0   : > { %1685 = vmatprep.mubr.bf16.mxu0 %v511_v36  ;;  %1771 = vmatprep.mubr.bf16.mxu1 %v511_v36  ;;  %v4163_v36 = vld [vmem:[#allocation8 + $0x668] ss:$16 sps:$4 sm:$0xff]  }
 0x1a1   : > { %1686 = vmatmul.mubr.bf16.vlgmr.msra.gmra.mrb[4].mxu0 %v510_v33  ;;  %1772 = vmatmul.mubr.bf16.vlgmr.msra.gmra.mrb[4].mxu1 %v510_v33  ;;  %v4165_v33 = vld [vmem:[#allocation8 + $0x66c] ss:$16 sps:$4 sm:$0xff]  }
 0x1a2   : > { %1697 = vmatpush1.bf16.msra.mxu0 %v4069_v37  ;;  %1783 = vmatpush1.bf16.msra.mxu1 %v4072_v38  ;;  %v4171_v37 = vld [vmem:[#allocation8 + $0x68c] ss:$16 sps:$4 sm:$0xff]   ;;  %v4142_v38 = vld [vmem:[#allocation8 + $0x600] ss:$16 sps:$4 sm:$0xff]  }
 0x1a3   : > { %1698 = vmatprep.subr.bf16.mxu0 %v4077_v40  ;;  %1784 = vmatprep.subr.bf16.mxu1 %v4080_v5  ;;  %v4169_v40 = vld [vmem:[#allocation8 + $0x688] ss:$16 sps:$4 sm:$0xff]   ;;  %v4177_v5 = vld [vmem:[#allocation8 + $0x6ac] ss:$16 sps:$4 sm:$0xff]  }
 0x1a4   : > { %1728 = vmatprep.mubr.bf16.mxu0 %v4543_v0  ;;  %1814 = vmatprep.mubr.bf16.mxu1 %v4543_v0 }
 0x1a6   : > { %1699 = vmatpush1.bf16.msra.mxu0 %v4075_v43  ;;  %1785 = vmatpush1.bf16.msra.mxu1 %v4078_v44  ;;  %v4175_v43 = vld [vmem:[#allocation8 + $0x6a8] ss:$16 sps:$4 sm:$0xff]   ;;  %v4183_v44 = vld [vmem:[#allocation8 + $0x6cc] ss:$16 sps:$4 sm:$0xff]  }
 0x1a7   : > { %1700 = vmatprep.subr.bf16.mxu0 %v4083_v45  ;;  %1786 = vmatprep.subr.bf16.mxu1 %v4086_v46  ;;  %v4154_v45 = vld [vmem:[#allocation8 + $0x640] ss:$16 sps:$4 sm:$0xff]   ;;  %v4162_v46 = vld [vmem:[#allocation8 + $0x664] ss:$16 sps:$4 sm:$0xff]  }
 0x1aa   : > { %1701 = vmatpush1.bf16.msra.mxu0 %v4081_v47  ;;  %1787 = vmatpush1.bf16.msra.mxu1 %v4084_v48  ;;  %v4181_v47 = vld [vmem:[#allocation8 + $0x6c8] ss:$16 sps:$4 sm:$0xff]   ;;  %v4160_v48 = vld [vmem:[#allocation8 + $0x660] ss:$16 sps:$4 sm:$0xff]  }
 0x1ab   : > { %1702 = vmatprep.subr.bf16.mxu0 %v4089_v49  ;;  %1788 = vmatprep.subr.bf16.mxu1 %v4092_v50  ;;  %v4168_v49 = vld [vmem:[#allocation8 + $0x684] ss:$16 sps:$4 sm:$0xff]   ;;  %v4166_v50 = vld [vmem:[#allocation8 + $0x680] ss:$16 sps:$4 sm:$0xff]  }
 0x1ae   : > { %1703 = vmatpush1.bf16.msra.mxu0 %v4087_v51  ;;  %1789 = vmatpush1.bf16.msra.mxu1 %v4090_v52  ;;  %v4174_v51 = vld [vmem:[#allocation8 + $0x6a4] ss:$16 sps:$4 sm:$0xff]   ;;  %v4172_v52 = vld [vmem:[#allocation8 + $0x6a0] ss:$16 sps:$4 sm:$0xff]  }
 0x1af   : > { %1836 = vmatprep.subr.bf16.mxu0 %v4270_v54  ;;  %2493 = vmatprep.subr.bf16.mxu1 %v4099_v53  ;;  %v4180_v53 = vld [vmem:[#allocation8 + $0x6c4] ss:$16 sps:$4 sm:$0xff]   ;;  %v4178_v54 = vld [vmem:[#allocation8 + $0x6c0] ss:$16 sps:$4 sm:$0xff]  }
 0x1b1   : > { %3450 = vmatmul.mubr.msk.bf16.vlgmr.msra.gmra.mrb[4].mxu0 %vm1074_vm2, %v512_v41  ;;  %3451 = vmatmul.mubr.msk.bf16.vlgmr.msra.gmra.mrb[4].mxu1 %vm1074_vm2, %v512_v41  ;;  %v4148_v41 = vld [vmem:[#allocation8 + $0x620] ss:$16 sps:$4 sm:$0xff]  }
 0x1b2   : > { %1837 = vmatpush1.bf16.msra.mxu0 %v4271_v57  ;;  %1868 = vmatprep.mubr.bf16.mxu0 %v4543_v0  ;;  %v4184_v57 = vld [vmem:[#allocation8 + $0x6e0] ss:$16 sps:$4 sm:$0xff]  }
 0x1b3   : > { %3621 = vmatprep.subr.bf16.mxu0 %v4544_v1  ;;  %2494 = vmatpush1.bf16.msra.mxu1 %v4097_v55  ;;  %v4186_v55 = vld [vmem:[#allocation8 + $0x6e4] ss:$16 sps:$4 sm:$0xff]  }
 0x1b4   : > { %2495 = vmatprep.subr.bf16.mxu1 %v4105_v56  ;;  %v4189_v56 = vld [vmem:[#allocation8 + $0x6ec] ss:$16 sps:$4 sm:$0xff]  }
 0x1b7   : > { %2496 = vmatpush1.bf16.msra.mxu1 %v4103_v58  ;;  %v4187_v58 = vld [vmem:[#allocation8 + $0x6e8] ss:$16 sps:$4 sm:$0xff]  }
 0x1b8   : > { %2497 = vmatprep.subr.bf16.mxu1 %v4111_v59  ;;  %v4192_v59 = vld [vmem:[#allocation8 + $0x704] ss:$16 sps:$4 sm:$0xff]  }
 0x1b9   : > { %3453 = vmatmul.mubr.msk.bf16.vlgmr.msra.gmra.mrb[8].mxu0 %vm422_vm1, %v4883_v60 }
 0x1ba   : > { %3622 = vmatpush3.bf16.msra.mxu0 %v4272_v2  ;;  %3623 = vmatprep.mubr.msk.bf16.mxu0 %vm4545_vm0, %v4544_v1 }
 0x1bb   : > { %2407 = vmatprep.subr.bf16.mxu0 %v4096_v61  ;;  %2498 = vmatpush1.bf16.msra.mxu1 %v4109_v62  ;;  %v4195_v61 = vld [vmem:[#allocation8 + $0x70c] ss:$16 sps:$4 sm:$0xff]  }
 0x1bc   : > { %2499 = vmatprep.subr.bf16.mxu1 %v4117_v63 }
 0x1bf   : > { %2500 = vmatpush1.bf16.msra.mxu1 %v4115_v4 }
 0x1c0   : > { %2501 = vmatprep.subr.bf16.mxu1 %v4123_v6 }
 0x1c1   : > { %3624 = vmatmul.mubr.msk.bf16.vlgmr.msra.gmra.mrb[12].mxu0 %vm422_vm1, %v4883_v60 }
 0x1c2   : > { %2408 = vmatpush1.bf16.msra.mxu0 %v4094_v7 }
 0x1c3   : > { %2409 = vmatprep.subr.bf16.mxu0 %v4102_v8  ;;  %2502 = vmatpush1.bf16.msra.mxu1 %v4121_v9  ;;  %v4190_v8 = vld [vmem:[#allocation8 + $0x700] ss:$16 sps:$4 sm:$0xff]   ;;  %v4193_v9 = vld [vmem:[#allocation8 + $0x708] ss:$16 sps:$4 sm:$0xff]  }
 0x1c4   : > { %2503 = vmatprep.subr.bf16.mxu1 %v4129_v10  ;;  %v4198_v10 = vld [vmem:[#allocation8 + $0x724] ss:$16 sps:$4 sm:$0xff]  }
 0x1c6   : > { %2410 = vmatpush1.bf16.msra.mxu0 %v4100_v11  ;;  %v4201_v11 = vld [vmem:[#allocation8 + $0x72c] ss:$16 sps:$4 sm:$0xff]  }
 0x1c7   : > { %2411 = vmatprep.subr.bf16.mxu0 %v4108_v12  ;;  %2504 = vmatpush1.bf16.msra.mxu1 %v4127_v13  ;;  %v4196_v12 = vld [vmem:[#allocation8 + $0x720] ss:$16 sps:$4 sm:$0xff]   ;;  %v4199_v13 = vld [vmem:[#allocation8 + $0x728] ss:$16 sps:$4 sm:$0xff]  }
 0x1c8   : > { %2505 = vmatprep.subr.bf16.mxu1 %v4135_v14 }
 0x1ca   : > { %2412 = vmatpush1.bf16.msra.mxu0 %v4106_v15  ;;  %v4204_v15 = vld [vmem:[#allocation8 + $0x744] ss:$16 sps:$4 sm:$0xff]  }
 0x1cb   : > { %2413 = vmatprep.subr.bf16.mxu0 %v4114_v16  ;;  %2506 = vmatpush1.bf16.msra.mxu1 %v4133_v17  ;;  %v4207_v16 = vld [vmem:[#allocation8 + $0x74c] ss:$16 sps:$4 sm:$0xff]  }
 0x1cc   : > { %2507 = vmatprep.subr.bf16.mxu1 %v4141_v18 }
 0x1ce   : > { %2414 = vmatpush1.bf16.msra.mxu0 %v4112_v19 }
 0x1cf   : > { %2415 = vmatprep.subr.bf16.mxu0 %v4120_v20  ;;  %2508 = vmatpush1.bf16.msra.mxu1 %v4139_v21  ;;  %v4202_v21 = vld [vmem:[#allocation8 + $0x740] ss:$16 sps:$4 sm:$0xff]  }
 0x1d0   : > { %2509 = vmatprep.subr.bf16.mxu1 %v4147_v22  ;;  %v4205_v22 = vld [vmem:[#allocation8 + $0x748] ss:$16 sps:$4 sm:$0xff]  }
 0x1d2   : > { %2416 = vmatpush1.bf16.msra.mxu0 %v4118_v23  ;;  %v4210_v23 = vld [vmem:[#allocation8 + $0x764] ss:$16 sps:$4 sm:$0xff]  }
 0x1d3   : > { %2417 = vmatprep.subr.bf16.mxu0 %v4126_v24  ;;  %2510 = vmatpush1.bf16.msra.mxu1 %v4145_v3  ;;  %v4213_v24 = vld [vmem:[#allocation8 + $0x76c] ss:$16 sps:$4 sm:$0xff]   ;;  %v4208_v3 = vld [vmem:[#allocation8 + $0x760] ss:$16 sps:$4 sm:$0xff]  }
 0x1d4   : > { %2511 = vmatprep.subr.bf16.mxu1 %v4153_v25  ;;  %v4211_v25 = vld [vmem:[#allocation8 + $0x768] ss:$16 sps:$4 sm:$0xff]  }
 0x1d6   : > { %2418 = vmatpush1.bf16.msra.mxu0 %v4124_v26 }
 0x1d7   : > { %2419 = vmatprep.subr.bf16.mxu0 %v4132_v27  ;;  %2512 = vmatpush1.bf16.msra.mxu1 %v4151_v28  ;;  %v398_v27 = vld [vmem:[%s5061_s5] sm:$0xf] }
 0x1d8   : > { %2513 = vmatprep.subr.bf16.mxu1 %v4159_v29 }
 0x1da   : > { %2420 = vmatpush1.bf16.msra.mxu0 %v4130_v30  ;;  %v4222_v30 = vld [vmem:[#allocation10] sm:$0xff]  }
 0x1db   : > { %2421 = vmatprep.subr.bf16.mxu0 %v4138_v31  ;;  %2514 = vmatpush1.bf16.msra.mxu1 %v4157_v32  ;;  %v4223_v31 = vld [vmem:[#allocation10 + $0x8] sm:$0xff]   ;;  %v4224_v32 = vld [vmem:[#allocation10 + $0x10] sm:$0xff]  }
 0x1dc   : > { %2515 = vmatprep.subr.bf16.mxu1 %v4165_v33  ;;  %v4225_v33 = vld [vmem:[#allocation10 + $0x18] sm:$0xff]  }
 0x1de   : > { %2422 = vmatpush1.bf16.msra.mxu0 %v4136_v34  ;;  %v4226_v34 = vld [vmem:[#allocation10 + $0x20] sm:$0xff]  }
 0x1df   : > { %2423 = vmatprep.subr.bf16.mxu0 %v4144_v35  ;;  %2516 = vmatpush1.bf16.msra.mxu1 %v4163_v36  ;;  %v4227_v35 = vld [vmem:[#allocation10 + $0x28] sm:$0xff]   ;;  %v4228_v36 = vld [vmem:[#allocation10 + $0x30] sm:$0xff]  }
 0x1e0   : > { %2517 = vmatprep.subr.bf16.mxu1 %v4171_v37 }
 0x1e2   : > { %2424 = vmatpush1.bf16.msra.mxu0 %v4142_v38 }
 0x1e3   : > { %2425 = vmatprep.subr.bf16.mxu0 %v4150_v39  ;;  %2518 = vmatpush1.bf16.msra.mxu1 %v4169_v40 }
 0x1e4   : > { %2519 = vmatprep.subr.bf16.mxu1 %v4177_v5 }
 0x1e6   : > { %2426 = vmatpush1.bf16.msra.mxu0 %v4148_v41 }
 0x1e7   : > { %2427 = vmatprep.subr.bf16.mxu0 %v4156_v42  ;;  %2520 = vmatpush1.bf16.msra.mxu1 %v4175_v43 }
 0x1e8   : > { %2521 = vmatprep.subr.bf16.mxu1 %v4183_v44 }
 0x1ea   : > { %2428 = vmatpush1.bf16.msra.mxu0 %v4154_v45 }
 0x1eb   : > { %2429 = vmatprep.subr.bf16.mxu0 %v4162_v46  ;;  %2522 = vmatpush1.bf16.msra.mxu1 %v4181_v47 }
 0x1ec   : > { %2523 = vmatprep.subr.bf16.mxu1 %v4189_v56 }
 0x1ee   : > { %2430 = vmatpush1.bf16.msra.mxu0 %v4160_v48 }
 0x1ef   : > { %2431 = vmatprep.subr.bf16.mxu0 %v4168_v49  ;;  %2524 = vmatpush1.bf16.msra.mxu1 %v4187_v58 }
 0x1f0   : > { %2536 = vmatprep.subr.bf16.mxu1 %v4195_v61 }
 0x1f2   : > { %2432 = vmatpush1.bf16.msra.mxu0 %v4166_v50 }
 0x1f3   : > { %2433 = vmatprep.subr.bf16.mxu0 %v4174_v51 }
 0x1f6   : > { %2434 = vmatpush1.bf16.msra.mxu0 %v4172_v52 }
 0x1f7   : > { %2435 = vmatprep.subr.bf16.mxu0 %v4180_v53 }
 0x1fa   : > { %2436 = vmatpush1.bf16.msra.mxu0 %v4178_v54 }
 0x1fb   : > { %2437 = vmatprep.subr.bf16.mxu0 %v4186_v55 }
 0x1fe   : > { %2438 = vmatpush1.bf16.msra.mxu0 %v4184_v57 }
 0x1ff   : > { %2450 = vmatprep.subr.bf16.mxu0 %v4192_v59 }
 0x28c   : > { %v1870_v62 = vpop.f32.mrb[8].mxu0 }
 0x28d   : > { %v1872_v63 = vpop.f32.mrb[9].mxu0 }
 0x28e   : > { %v1874_v2 = vpop.f32.mrb[10].mxu0 }
 0x28f   : > { %v1920_v4 = vpack.c.bf16 %v1874_v2, %v1870_v62  ;;  %v1876_v6 = vpop.f32.mrb[11].mxu0 }
 0x290   : > { %v1921_v7 = vpack.c.bf16 %v1876_v6, %v1872_v63 }
 0x292   : > { %2439 = vmatprep.mubr.bf16.mxu0 %v1921_v7  ;;  %2525 = vmatprep.mubr.bf16.mxu1 %v1921_v7 }
 0x293   : > { %2440 = vmatmul.mubr.bf16.vlgmr.msra.gmra.mrb[4].mxu0 %v1920_v4  ;;  %2526 = vmatmul.mubr.bf16.vlgmr.msra.gmra.mrb[4].mxu1 %v1920_v4 }
 0x294   : > { %2451 = vmatpush1.bf16.msra.mxu0 %v4190_v8  ;;  %2537 = vmatpush1.bf16.msra.mxu1 %v4193_v9  ;;  %v1913_v14 = vpop.f32.mrb[12].mxu0 }
 0x295   : > { %2452 = vmatprep.subr.bf16.mxu0 %v4198_v10  ;;  %2538 = vmatprep.subr.bf16.mxu1 %v4201_v11  ;;  %v3625_v17 = vpop.f32.mrb[13].mxu0 }
 0x296   : > { %v1916_v18 = vpop.f32.mrb[14].mxu0  ;;  %2482 = vmatprep.mubr.bf16.mxu0 %v4543_v0  ;;  %2568 = vmatprep.mubr.bf16.mxu1 %v4543_v0  ;;  %v2588_v0 = vlaneseq }
 0x297   : > { %v1922_v19 = vpack.c.bf16 %v1916_v18, %v1913_v14  ;;  %v3626_v20 = vpop.f32.mrb[15].mxu0  ;;  %v397_v18 = vld [vmem:[%s338_s11 + $0x8] sm:$0xff] }
 0x298   : > { %2453 = vmatpush1.bf16.msra.mxu0 %v4196_v12  ;;  %2539 = vmatpush1.bf16.msra.mxu1 %v4199_v13  ;;  %v2589_v26 = vshrl.u32 %v2588_v0, 7  ;;  %v396_v13 = vld [vmem:[%s338_s11] sm:$0xff] }
 0x299   : > { %2454 = vmatprep.subr.bf16.mxu0 %v4204_v15  ;;  %2540 = vmatprep.subr.bf16.mxu1 %v4207_v16  ;;  %v4273_v0 = vld [vmem:[#allocation7] sm:$0xff]  }
 0x29a   : > { %v2602_v28 = vsub.s32 3, %v2589_v26  ;;  %v2590_v37 = vsub.s32 0, %v2589_v26  ;;  %v2594_v38 = vsub.s32 1, %v2589_v26  ;;  %v2598_v53 = vsub.s32 2, %v2589_v26  ;;  %v4215_v26 = vld [vmem:[#allocation10 + $0x48] sm:$0xff]  }
 0x29c   : > { %2455 = vmatpush1.bf16.msra.mxu0 %v4202_v21  ;;  %2541 = vmatpush1.bf16.msra.mxu1 %v4205_v22  ;;  %v2603_v29 = vrot.slane %v398_v27, %v2602_v28  ;;  %v2591_v39 = vrot.slane %v398_v27, %v2590_v37  ;;  %v2595_v40 = vrot.slane %v398_v27, %v2594_v38  ;;  %v4217_v28 = vld [vmem:[#allocation10 + $0x58] sm:$0xff]   ;;  %v4230_v37 = vld [vmem:[#allocation10 + $0x80] sm:$0xff]  }
 0x29d   : > { %2456 = vmatprep.subr.bf16.mxu0 %v4210_v23  ;;  %2542 = vmatprep.subr.bf16.mxu1 %v4213_v24  ;;  %v2599_v59 = vrot.slane %v398_v27, %v2598_v53  ;;  %v4216_v27 = vld [vmem:[#allocation10 + $0x50] sm:$0xff]  }
 0x2a0   : > { %2457 = vmatpush1.bf16.msra.mxu0 %v4208_v3  ;;  %2543 = vmatpush1.bf16.msra.mxu1 %v4211_v25  ;;  %v4214_v25 = vld [vmem:[#allocation10 + $0x40] sm:$0xff]  }
 0x2a1   : > { %3627 = vmatprep.subr.bf16.mxu0 %v4544_v1  ;;  %3653 = vmatprep.subr.bf16.mxu1 %v4544_v1 }
 0x2a3   : > { %3535 = vmatmul.mubr.msk.bf16.vlgmr.msra.gmra.mrb[4].mxu0 %vm1074_vm2, %v1922_v19  ;;  %3536 = vmatmul.mubr.msk.bf16.vlgmr.msra.gmra.mrb[4].mxu1 %vm1074_vm2, %v1922_v19 }
 0x2a4   : > { %3629 = vmatprep.mubr.msk.bf16.mxu0 %vm4545_vm0, %v4544_v1  ;;  %3669 = vmatprep.mubr.msk.bf16.mxu1 %vm4545_vm0, %v4544_v1 }
 0x2a5   : > { %3654 = vmatpush3.bf16.msra.mxu1 %v4222_v30  ;;  %v4219_v30 = vld [vmem:[#allocation10 + $0x68] sm:$0xff]  }
 0x2a6   : > { %3655 = vmatprep.subr.bf16.mxu1 %v4544_v1 }
 0x2a9   : > { %3656 = vmatpush3.bf16.msra.mxu1 %v4223_v31  ;;  %v4220_v31 = vld [vmem:[#allocation10 + $0x70] sm:$0xff]  }
 0x2aa   : > { %3657 = vmatprep.subr.bf16.mxu1 %v4544_v1 }
 0x2ad   : > { %3658 = vmatpush3.bf16.msra.mxu1 %v4224_v32  ;;  %v4221_v32 = vld [vmem:[#allocation10 + $0x78] sm:$0xff]  }
 0x2ae   : > { %3659 = vmatprep.subr.bf16.mxu1 %v4544_v1 }
 0x2b1   : > { %3660 = vmatpush3.bf16.msra.mxu1 %v4225_v33  ;;  %v4229_v33 = vld [vmem:[#allocation10 + $0x38] sm:$0xff]  }
 0x2b2   : > { %3661 = vmatprep.subr.bf16.mxu1 %v4544_v1 }
 0x2b5   : > { %3662 = vmatpush3.bf16.msra.mxu1 %v4226_v34 }
 0x2b6   : > { %3663 = vmatprep.subr.bf16.mxu1 %v4544_v1 }
 0x2b9   : > { %3664 = vmatpush3.bf16.msra.mxu1 %v4227_v35 }
 0x2ba   : > { %3665 = vmatprep.subr.bf16.mxu1 %v4544_v1 }
 0x2bd   : > { %3666 = vmatpush3.bf16.msra.mxu1 %v4228_v36 }
 0x2be   : > { %3667 = vmatprep.subr.bf16.mxu1 %v4544_v1 }
 0x2c1   : > { %3668 = vmatpush3.bf16.msra.mxu1 %v4229_v33 }
 0x2c2   : > { %3679 = vmatprep.subr.bf16.mxu1 %v4544_v1 }
 0x376   : > { %v2484_v5 = vpop.f32.mrb[4].mxu0  ;;  %v2570_v41 = vpop.f32.mrb[4].mxu1 }
 0x377   : > { %v2608_v42 = vadd.f32 %v2591_v39, %v2484_v5  ;;  %v2486_v43 = vpop.f32.mrb[5].mxu0  ;;  %v2572_v44 = vpop.f32.mrb[5].mxu1  ;;  %v2610_v61 = vadd.f32 %v2599_v59, %v2570_v41  ;;  %v4233_v5 = vld [vmem:[#allocation10 + $0x98] sm:$0xff]   ;;  %v4234_v41 = vld [vmem:[#allocation10 + $0xa0] sm:$0xff]  }
 0x378   : > { %v2609_v45 = vadd.f32 %v2595_v40, %v2486_v43  ;;  %v4912_v46 = vadd.f32 %v2603_v29, %v2572_v44  ;;  %v2488_v47 = vpop.f32.mrb[6].mxu0  ;;  %v2574_v48 = vpop.f32.mrb[6].mxu1  ;;  %v4236_v43 = vld [vmem:[#allocation10 + $0xb0] sm:$0xff]   ;;  %v4237_v44 = vld [vmem:[#allocation10 + $0xb8] sm:$0xff]  }
 0x379   : > { %v3537_v49 = vmul.f32 -1.442695, %v2608_v42  ;;  %v2612_v50 = vadd.f32 %v2591_v39, %v2488_v47  ;;  %v2490_v51 = vpop.f32.mrb[7].mxu0  ;;  %v2576_v52 = vpop.f32.mrb[7].mxu1  ;;  %v2614_v62 = vadd.f32 %v2599_v59, %v2574_v48  ;;  %v4235_v42 = vld [vmem:[#allocation10 + $0xa8] sm:$0xff]  }
 0x37a   : > { %v3539_v54 = vmul.f32 -1.442695, %v2609_v45  ;;  %v2613_v55 = vadd.f32 %v2595_v40, %v2490_v51  ;;  %v4914_v56 = vadd.f32 %v2603_v29, %v2576_v52  ;;  %v4218_v29 = vld [vmem:[#allocation10 + $0x60] sm:$0xff]   ;;  %v4231_v40 = vld [vmem:[#allocation10 + $0x88] sm:$0xff]  }
 0x37b   : > { %4238 = vpow2.f32 %v3537_v49  ;;  %v3538_v57 = vmul.f32 -1.442695, %v2612_v50 }
 0x37c   : > { %4240 = vpow2.f32 %v3539_v54  ;;  %v3540_v58 = vmul.f32 -1.442695, %v2613_v55 }
 0x37d   : > { %4242 = vpow2.f32 %v3538_v57 }
 0x37e   : > { %4244 = vpow2.f32 %v3540_v58 }
 0x37f   : > { %4246 = vtanh.f32 %v2610_v61 }
 0x380   : > { %4248 = vtanh.f32 %v2614_v62 }
 0x385   : > { %v4239_v63 = vpop.eup %4238 }
 0x386   : > { %v4241_v2 = vpop.eup %4240  ;;  %v2622_v4 = vadd.f32 1.0, %v4239_v63 }
 0x387   : > { %v4243_v6 = vpop.eup %4242  ;;  %v2634_v7 = vadd.f32 1.0, %v4241_v2 }
 0x388   : > { %4250 = vrcp.f32 %v2622_v4  ;;  %v2623_v8 = vadd.f32 1.0, %v4243_v6  ;;  %v4245_v9 = vpop.eup %4244 }
 0x389   : > { %4252 = vrcp.f32 %v2634_v7  ;;  %v2635_v10 = vadd.f32 1.0, %v4245_v9  ;;  %v4247_v11 = vpop.eup %4246 }
 0x38a   : > { %4254 = vrcp.f32 %v2623_v8  ;;  %v4249_v12 = vpop.eup %4248 }
 0x38b   : > { %4256 = vrcp.f32 %v2635_v10 }
 0x392   : > { %v4251_v14 = vpop.eup %4250 }
 0x393   : > { %v4253_v15 = vpop.eup %4252  ;;  %v2644_v16 = vmul.f32 %v4251_v14, %v4247_v11 }
 0x394   : > { %v4255_v17 = vpop.eup %4254  ;;  %v2642_v19 = vmul.f32 %v4253_v15, %v396_v13 }
 0x395   : > { %v2645_v20 = vmul.f32 %v4255_v17, %v4249_v12  ;;  %v4257_v21 = vpop.eup %4256 }
 0x396   : > { %v4920_v22 = vadd.f32 %v2644_v16, %v2642_v19  ;;  %v2643_v23 = vmul.f32 %v4257_v21, %v397_v18 }
 0x398   : > { %3072 = vst [vmem:[%s4923_s29] sm:$0xff] %v4920_v22  ;;  %v4927_v24 = vadd.f32 %v2645_v20, %v2643_v23 }
 0x39a   : > { %v2648_v3 = vpack.c.bf16 %v4927_v24, %v4920_v22  ;;  %3073 = vst [vmem:[%s4923_s29 + $0x8] sm:$0xff] %v4927_v24 }
 0x39c   : > { %3628 = vmatpush3.bf16.msra.mxu0 %v2648_v3 }
 0x39d   : > { %3633 = vmatprep.subr.bf16.mxu0 %v4544_v1 }
 0x39f   : > { %3630 = vmatmul.mubr.msk.bf16.vlgmr.msra.gmra.mrb[16].mxu0 %vm422_vm1, %v4273_v0 }
 0x3a0   : > { %3634 = vmatpush3.bf16.msra.mxu0 %v4214_v25  ;;  %3649 = vmatprep.mubr.msk.bf16.mxu0 %vm4545_vm0, %v4544_v1 }
 0x3a1   : > { %3635 = vmatprep.subr.bf16.mxu0 %v4544_v1 }
 0x3a4   : > { %3636 = vmatpush3.bf16.msra.mxu0 %v4215_v26 }
 0x3a5   : > { %3637 = vmatprep.subr.bf16.mxu0 %v4544_v1 }
 0x3a8   : > { %3638 = vmatpush3.bf16.msra.mxu0 %v4216_v27 }
 0x3a9   : > { %3639 = vmatprep.subr.bf16.mxu0 %v4544_v1 }
 0x3ac   : > { %3640 = vmatpush3.bf16.msra.mxu0 %v4217_v28 }
 0x3ad   : > { %3641 = vmatprep.subr.bf16.mxu0 %v4544_v1 }
 0x3b0   : > { %3642 = vmatpush3.bf16.msra.mxu0 %v4218_v29 }
 0x3b1   : > { %3643 = vmatprep.subr.bf16.mxu0 %v4544_v1 }
 0x3b4   : > { %3644 = vmatpush3.bf16.msra.mxu0 %v4219_v30 }
 0x3b5   : > { %3645 = vmatprep.subr.bf16.mxu0 %v4544_v1 }
 0x3b8   : > { %3646 = vmatpush3.bf16.msra.mxu0 %v4220_v31 }
 0x3b9   : > { %3647 = vmatprep.subr.bf16.mxu0 %v4544_v1 }
 0x3bc   : > { %3648 = vmatpush3.bf16.msra.mxu0 %v4221_v32 }
 0x3bd   : > { %3673 = vmatprep.subr.bf16.mxu0 %v4544_v1 }
 0x3bf   : > { %3650 = vmatmul.mubr.bf16.vlgmr.msra.gmra.mrb[20].mxu0 %v2648_v3 }
 0x3c0   : > { %3674 = vmatpush3.bf16.msra.mxu0 %v2648_v3  ;;  %3675 = vmatprep.mubr.msk.bf16.mxu0 %vm4545_vm0, %v4544_v1 }
 0x3c7   : > { %3676 = vmatmul.mubr.msk.bf16.vlgmr.msra.gmra.mrb[24].mxu0 %vm422_vm1, %v4883_v60  ;;  %v4232_v60 = vld [vmem:[#allocation10 + $0x90] sm:$0xff]  }
 0x472   : > { %v2683_v34 = vpop.f32.mrb[16].mxu0 }
 0x473   : > { %v3631_v35 = vpop.f32.mrb[17].mxu0 }
 0x474   : > { %v2686_v36 = vpop.f32.mrb[18].mxu0 }
 0x475   : > { %v2690_v38 = vpack.c.bf16 %v2686_v36, %v2683_v34  ;;  %v3632_v39 = vpop.f32.mrb[19].mxu0 }
 0x477   : > { %3670 = vmatmul.mubr.bf16.vlgmr.msra.gmra.mrb[8].mxu1 %v2690_v38 }
 0x478   : > { %3680 = vmatpush3.bf16.msra.mxu1 %v4230_v37  ;;  %3695 = vmatprep.mubr.msk.bf16.mxu1 %vm4545_vm0, %v4544_v1 }
 0x479   : > { %3681 = vmatprep.subr.bf16.mxu1 %v4544_v1 }
 0x47c   : > { %3682 = vmatpush3.bf16.msra.mxu1 %v4231_v40 }
 0x47d   : > { %3683 = vmatprep.subr.bf16.mxu1 %v4544_v1 }
 0x480   : > { %3684 = vmatpush3.bf16.msra.mxu1 %v4232_v60 }
 0x481   : > { %3685 = vmatprep.subr.bf16.mxu1 %v4544_v1 }
 0x484   : > { %3686 = vmatpush3.bf16.msra.mxu1 %v4233_v5 }
 0x485   : > { %3687 = vmatprep.subr.bf16.mxu1 %v4544_v1 }
 0x488   : > { %3688 = vmatpush3.bf16.msra.mxu1 %v4234_v41 }
 0x489   : > { %3689 = vmatprep.subr.bf16.mxu1 %v4544_v1 }
 0x48c   : > { %3690 = vmatpush3.bf16.msra.mxu1 %v4235_v42 }
 0x48d   : > { %3691 = vmatprep.subr.bf16.mxu1 %v4544_v1 }
 0x490   : > { %3692 = vmatpush3.bf16.msra.mxu1 %v4236_v43 }
 0x491   : > { %3693 = vmatprep.subr.bf16.mxu1 %v4544_v1 }
 0x492   : > { %v2806_v45 = vpop.f32.mrb[20].mxu0 }
 0x493   : > { %v3651_v47 = vpop.f32.mrb[21].mxu0 }
 0x494   : > { %v2809_v48 = vpop.f32.mrb[22].mxu0  ;;  %3694 = vmatpush3.bf16.msra.mxu1 %v4237_v44 }
 0x495   : > { %v3652_v49 = vpop.f32.mrb[23].mxu0 }
 0x49a   : > { %v2936_v50 = vpop.f32.mrb[24].mxu0 }
 0x49b   : > { %v3677_v51 = vpop.f32.mrb[25].mxu0 }
 0x49c   : > { %v2939_v52 = vpop.f32.mrb[26].mxu0 }
 0x49d   : > { %v2943_v53 = vpack.c.bf16 %v2939_v52, %v2936_v50  ;;  %v3678_v54 = vpop.f32.mrb[27].mxu0 }
 0x49f   : > { %3696 = vmatmul.mubr.bf16.vlgmr.msra.gmra.mrb[8].mxu1 %v2943_v53 }
 0x4a0   : > { %4431 = shalt.err (!%p4428_p3)
}
 0x4a1   : > { %s4432_s23 = scalar_lea.hbm %s4965_s12, 256  ;;  %s4436_s11 = scalar_lea.hbm %s5063_s7, 512 }
 0x4a2   : > { %p4433_p9 = scmp.ne.s32.totalorder %s4965_s12, %s4432_s23  ;;  %p4437_p7 = scmp.lt.u32.totalorder %s4965_s12, %s5063_s7 }
 0x4a3   : > { %p4438_p12 = scmp.lt.u32.totalorder %s4436_s11, %s4432_s23  ;;  %p4440_p2 = scmp.lt.u32.totalorder %s4432_s23, %s4965_s12 }
 0x4a4   : > { %p4434_p13 = pnand %p4433_p9, %p4738_p5 }
 0x4a5   : > { %p4439_p1 = por %p4438_p12, %p4437_p7 }
 0x4a6   : > { %p4435_p11 = pneg %p4434_p13 }
 0x4a7   : > { %p4441_p4 = por %p4440_p2, %p4439_p1 }
 0x4a9   : > { %p4442_p0 = pnand %p4441_p4, %p4435_p11 }
 0x4ab   : > { %4445 = shalt.err (!%p4442_p0)
}
 0x4ac   : > { %s4547_s29 = smov 128   ;;  %s4548_s2 = smov 8  }
 0x4ad   : > { %3765 = dma.vmem_to_hbm [thread:$0]  (%p4738_p5), %s4968_s17, 256, %s4965_s12, %s3080_s19, %s4547_s29, %s4547_s29, %s4548_s2  }
 0x4ae   : > { %s383_s20 = scalar_lea.vmem [#allocation11], %s4837_s3  ;;  %s5007_s4 = scalar_lea.hbm %s5062_s6, %s3578_s10 }
 0x4af   : > { %s3093_s12 = sshll.u32 %s383_s20, 4  ;;  %s3075_s18 = scalar_lea.sflag [#allocation4], %s4825_s14  ;;  %s5009_s12 = int_to_ptr.vmem [resolvable:$true] %s3093_s12 }
 0x4b0   : > { %s4446_s3 = scalar_lea.vmem %s5009_s12, 256  ;;  %s4549_s8 = smov [#allocation11]  }
 0x4b1   : > { %p4447_p8 = scmp.ne.s32.totalorder %s5009_s12, %s4446_s3  ;;  %s4450_s16 = sshll.u32 %s4549_s8, 4  ;;  %s4451_s16 = int_to_ptr.vmem [resolvable:$false] %s4450_s16 }
 0x4b2   : > { %s4452_s28 = scalar_lea.vmem %s4451_s16, 512  ;;  %p4453_p3 = scmp.lt.s32.totalorder %s5009_s12, %s4451_s16 }
 0x4b3   : > { %p4448_p6 = pnand %p4447_p8, %p4738_p5  ;;  %p4454_p9 = scmp.lt.s32.totalorder %s4452_s28, %s4446_s3 }
 0x4b5   : > { %p4449_p10 = pneg %p4448_p6  ;;  %p4455_p13 = por %p4454_p9, %p4453_p3 }
 0x4b7   : > { %p4456_p11 = pnand %p4455_p13, %p4449_p10 }
 0x572   : > { %v3043_v1 = vpop.f32.mrb[8].mxu1 }
 0x573   : > { %v3699_v55 = vadd.f32 %v3043_v1, %v2806_v45  ;;  %v3697_v57 = vpop.f32.mrb[9].mxu1 }
 0x574   : > { %v3046_v58 = vpop.f32.mrb[10].mxu1 }
 0x575   : > { %v3052_v59 = vadd.f32 %v3699_v55, %v4912_v46  ;;  %v3700_v61 = vadd.f32 %v3046_v58, %v2809_v48  ;;  %v3698_v62 = vpop.f32.mrb[11].mxu1 }
 0x577   : > { %v3567_v63 = vmul.f32 -1.442695, %v3052_v59  ;;  %v3053_v2 = vadd.f32 %v3700_v61, %v4914_v56 }
 0x579   : > { %4258 = vpow2.f32 %v3567_v63  ;;  %v3568_v4 = vmul.f32 -1.442695, %v3053_v2 }
 0x57b   : > { %4260 = vpow2.f32 %v3568_v4 }
 0x57c   : > { %4262 = vtanh.f32 %v4920_v22 }
 0x583   : > { %v4259_v6 = vpop.eup %4258 }
 0x584   : > { %v3060_v7 = vadd.f32 1.0, %v4259_v6 }
 0x585   : > { %v4261_v8 = vpop.eup %4260 }
 0x586   : > { %4264 = vrcp.f32 %v3060_v7  ;;  %v3061_v9 = vadd.f32 1.0, %v4261_v8  ;;  %v4263_v46 = vpop.eup %4262 }
 0x587   : > { %4266 = vtanh.f32 %v4927_v24 }
 0x588   : > { %4268 = vrcp.f32 %v3061_v9 }
 0x590   : > { %v4265_v10 = vpop.eup %4264 }
 0x591   : > { %v4267_v56 = vpop.eup %4266  ;;  %v3068_v11 = vmul.f32 %v4265_v10, %v4263_v46 }
 0x592   : > { %v4269_v12 = vpop.eup %4268 }
 0x593   : > { %v3069_v13 = vmul.f32 %v4269_v12, %v4267_v56  ;;  %3070 = vst [vmem:[%s383_s20] sm:$0xff] %v3068_v11 }
 0x595   : > { %3071 = vst [vmem:[%s383_s20 + $0x8] sm:$0xff] %v3069_v13 }
 0x596   : > { %4459 = shalt.err (!%p4456_p11)
}
 0x597   : > { %s4460_s10 = scalar_lea.hbm %s5007_s4, 256  ;;  %s4464_s9 = scalar_lea.hbm %s5062_s6, 512 }
 0x598   : > { %p4461_p7 = scmp.ne.s32.totalorder %s5007_s4, %s4460_s10  ;;  %p4465_p2 = scmp.lt.u32.totalorder %s5007_s4, %s5062_s6 }
 0x599   : > { %p4466_p4 = scmp.lt.u32.totalorder %s4464_s9, %s4460_s10  ;;  %p4468_p8 = scmp.lt.u32.totalorder %s4460_s10, %s5007_s4 }
 0x59a   : > { %p4462_p12 = pnand %p4461_p7, %p4738_p5 }
 0x59b   : > { %p4467_p0 = por %p4466_p4, %p4465_p2 }
 0x59c   : > { %p4463_p1 = pneg %p4462_p12 }
 0x59d   : > { %p4469_p6 = por %p4468_p8, %p4467_p0 }
 0x59f   : > { %p4470_p10 = pnand %p4469_p6, %p4463_p1 }
 0x5a1   : > { %4473 = shalt.err (!%p4470_p10)
}
 0x5a2   : > { %3764 = dma.vmem_to_hbm [thread:$0]  (%p4738_p5), %s5009_s12, 256, %s5007_s4, %s3075_s18, %s4547_s29, %s4547_s29, %s4548_s2  }
 0x5a3 PF: > { %s5095_s22 = sld [smem:[#allocation20_spill]]  ;;  %s3124_s20 = sand.u32 1, %s4516_s24  }
 0x5a4   : > { %p5097_p9 = scmp.ge.s32.totalorder %s4528_s27, 2  ;;  %s3125_s17 = scalar_lea.sflag [#allocation4], %s3124_s20 }
 0x5a9   : > { %p5096_p3 = scmp.ne.s32.totalorder %s5095_s22, 0 }
 0x5ab   : > { %p3786_p13 = pnand %p5097_p9, %p5096_p3 }
 0x5ad   : > { %4507 = dma.done.wait (!%p3786_p13), %s3125_s17, 256  }
 0x5ae   : > { %4509 = vsyncadd (!%p3786_p13), %s3125_s17, 4294967040  ;;  %s3134_s15 = scalar_lea.sflag [#allocation13], %s3124_s20 }
 0x5af   : > { %4511 = dma.done.wait (!%p3786_p13), %s3134_s15, 256  }
 0x5b0   : > { %4513 = vsyncadd (!%p3786_p13), %s3134_s15, 4294967040  ;;  %p28_p5 = scmp.ge.s32.totalorder %s4703_s21, 4   ;;  %s5098_s24 = smov %s4520_s25 }
 0x5b1   : > { %s5099_s25 = smov %s4524_s26  ;;  %s5100_s26 = smov %s4734_s13 }
 0x5b2   : > { %s5101_s27 = smov %s4703_s21  ;;  %30 = sbr.rel (!%p28_p5) target bundleno = 15 (0xf), region = 136 }
 0x5b9   :  { %3139 = vsyncpa [#allocation3], 1 }
 0x5ba   :  { %3141 = vsyncpa [#allocation3 + $0x1], 1 }
 0x5bb   :  { %3142 = vsyncpa [#allocation6], 1 }
 0x5bc   :  { %3144 = vsyncpa [#allocation6 + $0x1], 1 }
 0x5bd   :  { %3145 = vsyncpa [#allocation9], 1 }
 0x5be   :  { %3146 = vsyncpa [#allocation4], 1 }
 0x5bf   :  { %3148 = vsyncpa [#allocation4 + $0x1], 1 }
 0x5c0   :  { %3149 = vsyncpa [#allocation13], 1 }
 0x5c1   :  { %3151 = vsyncpa [#allocation13 + $0x1], 1 }

</bundles_post_ra>
